<compile_context>
chip_gen: v6e
topology: v6e:2x2x1
jax: 0.10.0
libtpu: 0.0.40
codegen_flags: <defaults>
</compile_context>

<pallas_src>
import numpy as np

import jax
import jax.numpy as jnp
from jax.experimental import pallas as pl
from jax.experimental.pallas import tpu as pltpu

LRELU_SLOPE = 0.01   # nn.LeakyReLU default
IN_EPS = 1e-5        # nn.InstanceNorm1d default


# --------------------------------------------------------------------------
# The fused Pallas kernel (one batch tile per grid step)
# --------------------------------------------------------------------------

def _vae_kernel(x_ref, noise_ref,
                s_in_ref, b_in_ref, s_e1_ref, b_e1_ref, s_e2_ref, b_e2_ref,
                s_d1_ref, b_d1_ref, s_d2_ref, b_d2_ref,
                e1w_ref, e2w_ref, zw_ref, zb_ref, dzw_ref, dzb_ref,
                d1w_ref, d2w_ref, d3w_ref, d3b_ref,
                preds_ref, zh_ref):
    f32 = jnp.float32
    x = x_ref[...]                                   # (TN, i_c*L), channel-major flat
    tn = x.shape[0]

    def dot(a, b):
        return jnp.dot(a, b, preferred_element_type=f32)

    def inorm(v, s_ref, b_ref, leaky):
        # InstanceNorm1d over length on channel-major flat (TN, C*L) activations.
        # One fused stats matmul: stack [v ; v*v] on the sublane axis against the
        # slim (C*L, C) per-channel mean matrix -> mean and E[x^2] in one push.
        stats = dot(jnp.concatenate([v, v * v], axis=0), s_ref[...])   # (2TN, C)
        m = stats[:tn]
        var = stats[tn:] - m * m                     # biased variance (matches torch)
        scale = jax.lax.rsqrt(var + IN_EPS)
        shift = -m * scale
        # One fused broadcast matmul: [scale ; shift] @ (C, C*L) 0/1 matrix.
        sb = dot(jnp.concatenate([scale, shift], axis=0), b_ref[...])  # (2TN, C*L)
        y = v * sb[:tn] + sb[tn:]
        if leaky:
            y = jnp.maximum(y, LRELU_SLOPE * y)      # LeakyReLU, no compare+select
        return y

    # ---- encoder ----
    h = inorm(x, s_in_ref, b_in_ref, False)          # InstanceNorm1d(i_c)
    h = dot(h, e1w_ref[...])                         # Conv1d(i_c,32,k4,s2,p1); bias
    h = inorm(h, s_e1_ref, b_e1_ref, True)           #   cancelled by IN. IN+LeakyReLU
    h = dot(h, e2w_ref[...])                         # Conv1d(32,64,k4,s2,p1); bias cancelled
    h = inorm(h, s_e2_ref, b_e2_ref, True)           # IN(64) + LeakyReLU

    # ---- latent heads (z_mean & z_var fused) + reparameterization ----
    zh = dot(h, zw_ref[...]) + zb_ref[...]           # (TN, 2*n_latent)
    n_latent = zh.shape[1] // 2
    mu = zh[:, :n_latent]
    lv = zh[:, n_latent:]
    std = jnp.exp(0.5 * lv)
    z = std * noise_ref[...] + mu

    # ---- decoder ----
    d = dot(z, dzw_ref[...]) + dzb_ref[...]          # decode_z Linear -> (TN, 64*z_dim)
    d = dot(d, d1w_ref[...])                         # ConvT1d(64,32,k3,s2,p0); bias cancelled
    d = inorm(d, s_d1_ref, b_d1_ref, True)           # IN(32) + LeakyReLU
    d = dot(d, d2w_ref[...])                         # ConvT1d(32,16,k3,s2,p1); bias cancelled
    d = inorm(d, s_d2_ref, b_d2_ref, True)           # IN(16) + LeakyReLU
    preds = jnp.tanh(dot(d, d3w_ref[...]) + d3b_ref[...])   # Conv1d(16,i_c,k4,p1)+Tanh
    preds_ref[...] = preds

    # ---- per-sample loss partials, packed into the latent output row ----
    diff = preds - x
    sse_per = jnp.sum(diff * diff, axis=1, keepdims=True)                # (TN, 1)
    kld_per = -0.5 * jnp.sum(1.0 + lv - mu * mu - std * std,
                             axis=1, keepdims=True)                      # (TN, 1)
    zh_ref[:, :2 * n_latent] = zh
    zh_ref[:, 2 * n_latent:2 * n_latent + 1] = sse_per
    zh_ref[:, 2 * n_latent + 1:] = kld_per


# --------------------------------------------------------------------------
# One-time (host side) parameter preparation
# --------------------------------------------------------------------------

def _conv1d_matrix(w, L_in, stride, padding):
    # w: (C_out, C_in, k), PyTorch Conv1d layout.
    # Returns M (C_in*L_in, C_out*L_out) with y_flat = x_flat @ M, flat = (C, L) row-major.
    w = np.asarray(w, np.float32)
    C_out, C_in, k = w.shape
    L_out = (L_in + 2 * padding - k) // stride + 1
    M = np.zeros((C_in * L_in, C_out * L_out), np.float32)
    for co in range(C_out):
        for ci in range(C_in):
            for t in range(k):
                for lo in range(L_out):
                    li = lo * stride + t - padding
                    if 0 <= li < L_in:
                        M[ci * L_in + li, co * L_out + lo] += w[co, ci, t]
    return jnp.asarray(M), L_out


def _conv_transpose1d_matrix(w, L_in, stride, padding):
    # w: (C_in, C_out, k), PyTorch ConvTranspose1d layout.
    w = np.asarray(w, np.float32)
    C_in, C_out, k = w.shape
    L_out = (L_in - 1) * stride + k - 2 * padding
    M = np.zeros((C_in * L_in, C_out * L_out), np.float32)
    for ci in range(C_in):
        for co in range(C_out):
            for t in range(k):
                for li in range(L_in):
                    lo = li * stride + t - padding
                    if 0 <= lo < L_out:
                        M[ci * L_in + li, co * L_out + lo] += w[ci, co, t]
    return jnp.asarray(M), L_out


def _inorm_stats_mats(C, L):
    # S: (C*L, C) with S[c*L+l, c] = 1/L  -> per-(n,c) mean via one matmul.
    # B: (C, C*L) with B[c, c*L+l] = 1    -> broadcast per-channel scalars over L.
    S = np.kron(np.eye(C, dtype=np.float32), np.full((L, 1), 1.0 / L, np.float32))
    B = np.kron(np.eye(C, dtype=np.float32), np.ones((1, L), np.float32))
    return jnp.asarray(S), jnp.asarray(B)


def _flat_bias(b, L_out):
    b = np.asarray(b, np.float32)
    return jnp.asarray(np.repeat(b, L_out))[None, :]


def prepare_params(p, i_c, n_latent, z_dim, L):
    e1_w, L1 = _conv1d_matrix(p["enc1_w"], L, stride=2, padding=1)
    e2_w, L2 = _conv1d_matrix(p["enc2_w"], L1, stride=2, padding=1)
    assert L2 == z_dim, (L2, z_dim)
    d1_w, Lt1 = _conv_transpose1d_matrix(p["dect1_w"], z_dim, stride=2, padding=0)
    d2_w, Lt2 = _conv_transpose1d_matrix(p["dect2_w"], Lt1, stride=2, padding=1)
    d3_w, L3 = _conv1d_matrix(p["dec3_w"], Lt2, stride=1, padding=1)
    assert L3 == L, (L3, L)

    s_in, b_in = _inorm_stats_mats(i_c, L)
    s_e1, b_e1 = _inorm_stats_mats(32, L1)
    s_e2, b_e2 = _inorm_stats_mats(64, L2)
    s_d1, b_d1 = _inorm_stats_mats(32, Lt1)
    s_d2, b_d2 = _inorm_stats_mats(16, Lt2)

    zm_w = np.asarray(p["zmean_w"], np.float32)
    zv_w = np.asarray(p["zvar_w"], np.float32)
    zm_b = np.asarray(p["zmean_b"], np.float32)
    zv_b = np.asarray(p["zvar_b"], np.float32)

    return {
        # slim instance-norm operators (mean matrix + 0/1 broadcast matrix)
        "s_in": s_in, "b_in": b_in, "s_e1": s_e1, "b_e1": b_e1,
        "s_e2": s_e2, "b_e2": b_e2, "s_d1": s_d1, "b_d1": b_d1,
        "s_d2": s_d2, "b_d2": b_d2,
        # conv / linear weights, matmul-ready.  enc1/enc2/dect1/dect2 biases are
        # intentionally dropped: a per-channel constant over length is exactly
        # cancelled by the InstanceNorm that immediately follows each of them.
        "e1_w": e1_w, "e2_w": e2_w,
        "zh_w": jnp.asarray(np.concatenate([zm_w, zv_w], axis=0).T),
        "zh_b": jnp.asarray(np.concatenate([zm_b, zv_b], axis=0))[None, :],
        "dz_w": jnp.asarray(np.asarray(p["dec_z_w"], np.float32).T),
        "dz_b": jnp.asarray(np.asarray(p["dec_z_b"], np.float32))[None, :],
        "d1_w": d1_w, "d2_w": d2_w,
        "d3_w": d3_w, "d3_b": _flat_bias(p["dec3_b"], L),
    }


# --------------------------------------------------------------------------
# Raw (PyTorch-layout) parameter init + forward wrapper
# --------------------------------------------------------------------------

def init_vae_params(key, i_c, n_latent, z_dim):
    def uinit(k, shape, fan_in):
        bound = 1.0 / float(fan_in) ** 0.5
        return jax.random.uniform(k, shape, jnp.float32, -bound, bound)

    keys = jax.random.split(key, 16)
    feat = 64 * z_dim
    return {
        # encoder convs (Conv1d weight layout: (C_out, C_in, k))
        "enc1_w": uinit(keys[0], (32, i_c, 4), i_c * 4),
        "enc1_b": uinit(keys[1], (32,), i_c * 4),
        "enc2_w": uinit(keys[2], (64, 32, 4), 32 * 4),
        "enc2_b": uinit(keys[3], (64,), 32 * 4),
        # latent heads (Linear weight layout: (out, in))
        "zmean_w": uinit(keys[4], (n_latent, feat), feat),
        "zmean_b": uinit(keys[5], (n_latent,), feat),
        "zvar_w": uinit(keys[6], (n_latent, feat), feat),
        "zvar_b": uinit(keys[7], (n_latent,), feat),
        "dec_z_w": uinit(keys[8], (feat, n_latent), n_latent),
        "dec_z_b": uinit(keys[9], (feat,), n_latent),
        # decoder (ConvTranspose1d weight layout: (C_in, C_out, k))
        "dect1_w": uinit(keys[10], (64, 32, 3), 32 * 3),
        "dect1_b": uinit(keys[11], (32,), 32 * 3),
        "dect2_w": uinit(keys[12], (32, 16, 3), 16 * 3),
        "dect2_b": uinit(keys[13], (16,), 16 * 3),
        "dec3_w": uinit(keys[14], (i_c, 16, 4), 16 * 4),
        "dec3_b": uinit(keys[15], (i_c,), 16 * 4),
    }


def vae_forward(prep, x, noise):
    N, i_c, L = x.shape
    n_latent = noise.shape[1]
    x_flat = x.reshape(N, i_c * L)                    # metadata-only reshape

    # One batch tile of 8 samples per grid step fills the sublane/MXU row dim.
    TN = 8 if N % 8 == 0 else N
    num_tiles = N // TN

    weights = (prep["s_in"], prep["b_in"], prep["s_e1"], prep["b_e1"],
               prep["s_e2"], prep["b_e2"], prep["s_d1"], prep["b_d1"],
               prep["s_d2"], prep["b_d2"],
               prep["e1_w"], prep["e2_w"],
               prep["zh_w"], prep["zh_b"], prep["dz_w"], prep["dz_b"],
               prep["d1_w"], prep["d2_w"], prep["d3_w"], prep["d3_b"])

    def batch_spec(last):
        return pl.BlockSpec((TN, last), lambda i: (i, 0))

    def const_spec(w):
        # Same block index for every grid step -> weight stays VMEM-resident,
        # DMA'd from HBM exactly once per call.
        return pl.BlockSpec(w.shape, lambda i: (0, 0))

    in_specs = ([batch_spec(i_c * L), batch_spec(n_latent)]
                + [const_spec(w) for w in weights])

    preds_flat, zh = pl.pallas_call(
        _vae_kernel,
        grid=(num_tiles,),
        out_shape=(
            jax.ShapeDtypeStruct((N, i_c * L), jnp.float32),
            jax.ShapeDtypeStruct((N, 2 * n_latent + 2), jnp.float32),
        ),
        in_specs=in_specs,
        out_specs=(batch_spec(i_c * L), batch_spec(2 * n_latent + 2)),
        compiler_params=pltpu.CompilerParams(
            dimension_semantics=("parallel",)),       # shard tiles over v7x's 2 TCs
    )(x_flat, noise, *weights)

    mu = zh[:, :n_latent]
    log_var = zh[:, n_latent:2 * n_latent]
    sse_per = zh[:, 2 * n_latent]                     # per-sample sum of squared error
    kld_per = zh[:, 2 * n_latent + 1]                 # per-sample -0.5*sum(1+lv-mu^2-e^lv)
    loss = jnp.sum(sse_per) / (N * i_c * L) + jnp.mean(kld_per)
    return preds_flat.reshape(N, i_c, L), mu, log_var, loss


# --------------------------------------------------------------------------

if __name__ == "__main__":
    key = jax.random.PRNGKey(0)
    k_param, k_x, k_noise = jax.random.split(key, 3)

    batch, i_c, seq = 16, 4, 16      # batch=16 -> two 8-sample tiles, grid=(2,)
    z_dim = seq // 4                 # encoder downsamples length by 4
    n_latent = 8

    raw_params = init_vae_params(k_param, i_c, n_latent, z_dim)
    prep = prepare_params(raw_params, i_c, n_latent, z_dim, seq)

    x = jax.random.normal(k_x, (batch, i_c, seq), jnp.float32)
    # TODO(synk): torch.randn_like uses PyTorch's RNG; noise here comes from
    # jax.random (same distribution, different bits).
    noise = jax.random.normal(k_noise, (batch, n_latent), jnp.float32)

    fwd = jax.jit(vae_forward)
    preds, mu, log_var, loss = fwd(prep, x, noise)
    jax.block_until_ready((preds, mu, log_var, loss))

    assert preds.shape == (batch, i_c, seq)
    assert mu.shape == (batch, n_latent)
    assert log_var.shape == (batch, n_latent)
    assert loss.shape == ()
    assert bool(jnp.isfinite(loss))
    print("KERNEL_OK")
</pallas_src>

<mosaic_0001>
module attributes {stable_mosaic.version = 11 : i64} {
  func.func @_vae_kernel(%arg0: i32, %arg1: memref<8x64xf32, #tpu.memory_space<vmem>>, %arg2: memref<8x8xf32, #tpu.memory_space<vmem>>, %arg3: memref<64x4xf32, #tpu.memory_space<vmem>>, %arg4: memref<4x64xf32, #tpu.memory_space<vmem>>, %arg5: memref<256x32xf32, #tpu.memory_space<vmem>>, %arg6: memref<32x256xf32, #tpu.memory_space<vmem>>, %arg7: memref<256x64xf32, #tpu.memory_space<vmem>>, %arg8: memref<64x256xf32, #tpu.memory_space<vmem>>, %arg9: memref<288x32xf32, #tpu.memory_space<vmem>>, %arg10: memref<32x288xf32, #tpu.memory_space<vmem>>, %arg11: memref<272x16xf32, #tpu.memory_space<vmem>>, %arg12: memref<16x272xf32, #tpu.memory_space<vmem>>, %arg13: memref<64x256xf32, #tpu.memory_space<vmem>>, %arg14: memref<256x256xf32, #tpu.memory_space<vmem>>, %arg15: memref<256x16xf32, #tpu.memory_space<vmem>>, %arg16: memref<1x16xf32, #tpu.memory_space<vmem>>, %arg17: memref<8x256xf32, #tpu.memory_space<vmem>>, %arg18: memref<1x256xf32, #tpu.memory_space<vmem>>, %arg19: memref<256x288xf32, #tpu.memory_space<vmem>>, %arg20: memref<288x272xf32, #tpu.memory_space<vmem>>, %arg21: memref<272x64xf32, #tpu.memory_space<vmem>>, %arg22: memref<1x64xf32, #tpu.memory_space<vmem>>, %arg23: memref<8x64xf32, #tpu.memory_space<vmem>>, %arg24: memref<8x18xf32, #tpu.memory_space<vmem>>) attributes {dimension_semantics = [#tpu.dimension_semantics<parallel>], iteration_bounds = array<i64: 2>, scalar_prefetch = 0 : i64, scratch_operands = 0 : i64, tpu.core_type = #tpu.core_type<tc>, window_params = [{transform_indices = @transform_0, window_bounds = array<i64: 8, 64>}, {transform_indices = @transform_1, window_bounds = array<i64: 8, 8>}, {pipeline_mode = #tpu.pipeline_mode<synchronous>, transform_indices = @transform_2, window_bounds = array<i64: 64, 4>}, {pipeline_mode = #tpu.pipeline_mode<synchronous>, transform_indices = @transform_3, window_bounds = array<i64: 4, 64>}, {pipeline_mode = #tpu.pipeline_mode<synchronous>, transform_indices = @transform_4, window_bounds = array<i64: 256, 32>}, {pipeline_mode = #tpu.pipeline_mode<synchronous>, transform_indices = @transform_5, window_bounds = array<i64: 32, 256>}, {pipeline_mode = #tpu.pipeline_mode<synchronous>, transform_indices = @transform_6, window_bounds = array<i64: 256, 64>}, {pipeline_mode = #tpu.pipeline_mode<synchronous>, transform_indices = @transform_7, window_bounds = array<i64: 64, 256>}, {pipeline_mode = #tpu.pipeline_mode<synchronous>, transform_indices = @transform_8, window_bounds = array<i64: 288, 32>}, {pipeline_mode = #tpu.pipeline_mode<synchronous>, transform_indices = @transform_9, window_bounds = array<i64: 32, 288>}, {pipeline_mode = #tpu.pipeline_mode<synchronous>, transform_indices = @transform_10, window_bounds = array<i64: 272, 16>}, {pipeline_mode = #tpu.pipeline_mode<synchronous>, transform_indices = @transform_11, window_bounds = array<i64: 16, 272>}, {pipeline_mode = #tpu.pipeline_mode<synchronous>, transform_indices = @transform_12, window_bounds = array<i64: 64, 256>}, {pipeline_mode = #tpu.pipeline_mode<synchronous>, transform_indices = @transform_13, window_bounds = array<i64: 256, 256>}, {pipeline_mode = #tpu.pipeline_mode<synchronous>, transform_indices = @transform_14, window_bounds = array<i64: 256, 16>}, {pipeline_mode = #tpu.pipeline_mode<synchronous>, transform_indices = @transform_15, window_bounds = array<i64: 1, 16>}, {pipeline_mode = #tpu.pipeline_mode<synchronous>, transform_indices = @transform_16, window_bounds = array<i64: 8, 256>}, {pipeline_mode = #tpu.pipeline_mode<synchronous>, transform_indices = @transform_17, window_bounds = array<i64: 1, 256>}, {pipeline_mode = #tpu.pipeline_mode<synchronous>, transform_indices = @transform_18, window_bounds = array<i64: 256, 288>}, {pipeline_mode = #tpu.pipeline_mode<synchronous>, transform_indices = @transform_19, window_bounds = array<i64: 288, 272>}, {pipeline_mode = #tpu.pipeline_mode<synchronous>, transform_indices = @transform_20, window_bounds = array<i64: 272, 64>}, {pipeline_mode = #tpu.pipeline_mode<synchronous>, transform_indices = @transform_21, window_bounds = array<i64: 1, 64>}, {transform_indices = @transform_22, window_bounds = array<i64: 8, 64>}, {transform_indices = @transform_23, window_bounds = array<i64: 8, 18>}]} {
    %c0 = arith.constant 0 : index
    %c0_0 = arith.constant 0 : index
    %0 = vector.load %arg1[%c0, %c0_0] : memref<8x64xf32, #tpu.memory_space<vmem>>, vector<8x64xf32>
    %1 = arith.mulf %0, %0 : vector<8x64xf32>
    %2 = tpu.concatenate %0, %1 in 0 : vector<8x64xf32>, vector<8x64xf32> -> vector<16x64xf32>
    %c0_1 = arith.constant 0 : index
    %c0_2 = arith.constant 0 : index
    %3 = vector.load %arg3[%c0_1, %c0_2] : memref<64x4xf32, #tpu.memory_space<vmem>>, vector<64x4xf32>
    %cst = arith.constant dense<0.000000e+00> : vector<16x4xf32>
    %4 = tpu.matmul %2, %3, %cst {dimension_numbers = #tpu.dot_dimension_numbers<[1], [0], [0], [1], [0, 0, 1, 1], [], []>} : vector<16x64xf32>, vector<64x4xf32>, vector<16x4xf32> -> vector<16x4xf32>
    %5 = vector.extract_strided_slice %4 {offsets = [0, 0], sizes = [8, 4], strides = [1, 1]} : vector<16x4xf32> to vector<8x4xf32>
    %6 = vector.extract_strided_slice %4 {offsets = [8, 0], sizes = [8, 4], strides = [1, 1]} : vector<16x4xf32> to vector<8x4xf32>
    %7 = arith.mulf %5, %5 : vector<8x4xf32>
    %8 = arith.subf %6, %7 : vector<8x4xf32>
    %cst_3 = arith.constant 9.99999974E-6 : f32
    %9 = vector.broadcast %cst_3 : f32 to vector<8x4xf32>
    %10 = arith.addf %8, %9 : vector<8x4xf32>
    %11 = math.rsqrt %10 : vector<8x4xf32>
    %cst_4 = arith.constant 0.000000e+00 : f32
    %12 = vector.broadcast %cst_4 : f32 to vector<8x4xf32>
    %13 = arith.subf %12, %5 : vector<8x4xf32>
    %14 = arith.mulf %13, %11 : vector<8x4xf32>
    %15 = tpu.concatenate %11, %14 in 0 : vector<8x4xf32>, vector<8x4xf32> -> vector<16x4xf32>
    %c0_5 = arith.constant 0 : index
    %c0_6 = arith.constant 0 : index
    %16 = vector.load %arg4[%c0_5, %c0_6] : memref<4x64xf32, #tpu.memory_space<vmem>>, vector<4x64xf32>
    %cst_7 = arith.constant dense<0.000000e+00> : vector<16x64xf32>
    %17 = tpu.matmul %15, %16, %cst_7 {dimension_numbers = #tpu.dot_dimension_numbers<[1], [0], [0], [1], [0, 0, 1, 1], [], []>} : vector<16x4xf32>, vector<4x64xf32>, vector<16x64xf32> -> vector<16x64xf32>
    %18 = vector.extract_strided_slice %17 {offsets = [0, 0], sizes = [8, 64], strides = [1, 1]} : vector<16x64xf32> to vector<8x64xf32>
    %19 = arith.mulf %0, %18 : vector<8x64xf32>
    %20 = vector.extract_strided_slice %17 {offsets = [8, 0], sizes = [8, 64], strides = [1, 1]} : vector<16x64xf32> to vector<8x64xf32>
    %21 = arith.addf %19, %20 : vector<8x64xf32>
    %c0_8 = arith.constant 0 : index
    %c0_9 = arith.constant 0 : index
    %22 = vector.load %arg13[%c0_8, %c0_9] : memref<64x256xf32, #tpu.memory_space<vmem>>, vector<64x256xf32>
    %cst_10 = arith.constant dense<0.000000e+00> : vector<8x256xf32>
    %23 = tpu.matmul %21, %22, %cst_10 {dimension_numbers = #tpu.dot_dimension_numbers<[1], [0], [0], [1], [0, 0, 1, 1], [], []>} : vector<8x64xf32>, vector<64x256xf32>, vector<8x256xf32> -> vector<8x256xf32>
    %24 = arith.mulf %23, %23 : vector<8x256xf32>
    %25 = tpu.concatenate %23, %24 in 0 : vector<8x256xf32>, vector<8x256xf32> -> vector<16x256xf32>
    %c0_11 = arith.constant 0 : index
    %c0_12 = arith.constant 0 : index
    %26 = vector.load %arg5[%c0_11, %c0_12] : memref<256x32xf32, #tpu.memory_space<vmem>>, vector<256x32xf32>
    %cst_13 = arith.constant dense<0.000000e+00> : vector<16x32xf32>
    %27 = tpu.matmul %25, %26, %cst_13 {dimension_numbers = #tpu.dot_dimension_numbers<[1], [0], [0], [1], [0, 0, 1, 1], [], []>} : vector<16x256xf32>, vector<256x32xf32>, vector<16x32xf32> -> vector<16x32xf32>
    %28 = vector.extract_strided_slice %27 {offsets = [0, 0], sizes = [8, 32], strides = [1, 1]} : vector<16x32xf32> to vector<8x32xf32>
    %29 = vector.extract_strided_slice %27 {offsets = [8, 0], sizes = [8, 32], strides = [1, 1]} : vector<16x32xf32> to vector<8x32xf32>
    %30 = arith.mulf %28, %28 : vector<8x32xf32>
    %31 = arith.subf %29, %30 : vector<8x32xf32>
    %cst_14 = arith.constant 9.99999974E-6 : f32
    %32 = vector.broadcast %cst_14 : f32 to vector<8x32xf32>
    %33 = arith.addf %31, %32 : vector<8x32xf32>
    %34 = math.rsqrt %33 : vector<8x32xf32>
    %cst_15 = arith.constant 0.000000e+00 : f32
    %35 = vector.broadcast %cst_15 : f32 to vector<8x32xf32>
    %36 = arith.subf %35, %28 : vector<8x32xf32>
    %37 = arith.mulf %36, %34 : vector<8x32xf32>
    %38 = tpu.concatenate %34, %37 in 0 : vector<8x32xf32>, vector<8x32xf32> -> vector<16x32xf32>
    %c0_16 = arith.constant 0 : index
    %c0_17 = arith.constant 0 : index
    %39 = vector.load %arg6[%c0_16, %c0_17] : memref<32x256xf32, #tpu.memory_space<vmem>>, vector<32x256xf32>
    %cst_18 = arith.constant dense<0.000000e+00> : vector<16x256xf32>
    %40 = tpu.matmul %38, %39, %cst_18 {dimension_numbers = #tpu.dot_dimension_numbers<[1], [0], [0], [1], [0, 0, 1, 1], [], []>} : vector<16x32xf32>, vector<32x256xf32>, vector<16x256xf32> -> vector<16x256xf32>
    %41 = vector.extract_strided_slice %40 {offsets = [0, 0], sizes = [8, 256], strides = [1, 1]} : vector<16x256xf32> to vector<8x256xf32>
    %42 = arith.mulf %23, %41 : vector<8x256xf32>
    %43 = vector.extract_strided_slice %40 {offsets = [8, 0], sizes = [8, 256], strides = [1, 1]} : vector<16x256xf32> to vector<8x256xf32>
    %44 = arith.addf %42, %43 : vector<8x256xf32>
    %cst_19 = arith.constant 0.00999999977 : f32
    %45 = vector.broadcast %cst_19 : f32 to vector<8x256xf32>
    %46 = arith.mulf %45, %44 : vector<8x256xf32>
    %47 = arith.maximumf %44, %46 : vector<8x256xf32>
    %c0_20 = arith.constant 0 : index
    %c0_21 = arith.constant 0 : index
    %48 = vector.load %arg14[%c0_20, %c0_21] : memref<256x256xf32, #tpu.memory_space<vmem>>, vector<256x256xf32>
    %cst_22 = arith.constant dense<0.000000e+00> : vector<8x256xf32>
    %49 = tpu.matmul %47, %48, %cst_22 {dimension_numbers = #tpu.dot_dimension_numbers<[1], [0], [0], [1], [0, 0, 1, 1], [], []>} : vector<8x256xf32>, vector<256x256xf32>, vector<8x256xf32> -> vector<8x256xf32>
    %50 = arith.mulf %49, %49 : vector<8x256xf32>
    %51 = tpu.concatenate %49, %50 in 0 : vector<8x256xf32>, vector<8x256xf32> -> vector<16x256xf32>
    %c0_23 = arith.constant 0 : index
    %c0_24 = arith.constant 0 : index
    %52 = vector.load %arg7[%c0_23, %c0_24] : memref<256x64xf32, #tpu.memory_space<vmem>>, vector<256x64xf32>
    %cst_25 = arith.constant dense<0.000000e+00> : vector<16x64xf32>
    %53 = tpu.matmul %51, %52, %cst_25 {dimension_numbers = #tpu.dot_dimension_numbers<[1], [0], [0], [1], [0, 0, 1, 1], [], []>} : vector<16x256xf32>, vector<256x64xf32>, vector<16x64xf32> -> vector<16x64xf32>
    %54 = vector.extract_strided_slice %53 {offsets = [0, 0], sizes = [8, 64], strides = [1, 1]} : vector<16x64xf32> to vector<8x64xf32>
    %55 = vector.extract_strided_slice %53 {offsets = [8, 0], sizes = [8, 64], strides = [1, 1]} : vector<16x64xf32> to vector<8x64xf32>
    %56 = arith.mulf %54, %54 : vector<8x64xf32>
    %57 = arith.subf %55, %56 : vector<8x64xf32>
    %cst_26 = arith.constant 9.99999974E-6 : f32
    %58 = vector.broadcast %cst_26 : f32 to vector<8x64xf32>
    %59 = arith.addf %57, %58 : vector<8x64xf32>
    %60 = math.rsqrt %59 : vector<8x64xf32>
    %cst_27 = arith.constant 0.000000e+00 : f32
    %61 = vector.broadcast %cst_27 : f32 to vector<8x64xf32>
    %62 = arith.subf %61, %54 : vector<8x64xf32>
    %63 = arith.mulf %62, %60 : vector<8x64xf32>
    %64 = tpu.concatenate %60, %63 in 0 : vector<8x64xf32>, vector<8x64xf32> -> vector<16x64xf32>
    %c0_28 = arith.constant 0 : index
    %c0_29 = arith.constant 0 : index
    %65 = vector.load %arg8[%c0_28, %c0_29] : memref<64x256xf32, #tpu.memory_space<vmem>>, vector<64x256xf32>
    %cst_30 = arith.constant dense<0.000000e+00> : vector<16x256xf32>
    %66 = tpu.matmul %64, %65, %cst_30 {dimension_numbers = #tpu.dot_dimension_numbers<[1], [0], [0], [1], [0, 0, 1, 1], [], []>} : vector<16x64xf32>, vector<64x256xf32>, vector<16x256xf32> -> vector<16x256xf32>
    %67 = vector.extract_strided_slice %66 {offsets = [0, 0], sizes = [8, 256], strides = [1, 1]} : vector<16x256xf32> to vector<8x256xf32>
    %68 = arith.mulf %49, %67 : vector<8x256xf32>
    %69 = vector.extract_strided_slice %66 {offsets = [8, 0], sizes = [8, 256], strides = [1, 1]} : vector<16x256xf32> to vector<8x256xf32>
    %70 = arith.addf %68, %69 : vector<8x256xf32>
    %cst_31 = arith.constant 0.00999999977 : f32
    %71 = vector.broadcast %cst_31 : f32 to vector<8x256xf32>
    %72 = arith.mulf %71, %70 : vector<8x256xf32>
    %73 = arith.maximumf %70, %72 : vector<8x256xf32>
    %c0_32 = arith.constant 0 : index
    %c0_33 = arith.constant 0 : index
    %74 = vector.load %arg15[%c0_32, %c0_33] : memref<256x16xf32, #tpu.memory_space<vmem>>, vector<256x16xf32>
    %cst_34 = arith.constant dense<0.000000e+00> : vector<8x16xf32>
    %75 = tpu.matmul %73, %74, %cst_34 {dimension_numbers = #tpu.dot_dimension_numbers<[1], [0], [0], [1], [0, 0, 1, 1], [], []>} : vector<8x256xf32>, vector<256x16xf32>, vector<8x16xf32> -> vector<8x16xf32>
    %c0_35 = arith.constant 0 : index
    %c0_36 = arith.constant 0 : index
    %76 = vector.load %arg16[%c0_35, %c0_36] : memref<1x16xf32, #tpu.memory_space<vmem>>, vector<1x16xf32>
    %77 = vector.broadcast %76 : vector<1x16xf32> to vector<8x16xf32>
    %78 = arith.addf %75, %77 : vector<8x16xf32>
    %79 = vector.extract_strided_slice %78 {offsets = [0, 0], sizes = [8, 8], strides = [1, 1]} : vector<8x16xf32> to vector<8x8xf32>
    %80 = vector.extract_strided_slice %78 {offsets = [0, 8], sizes = [8, 8], strides = [1, 1]} : vector<8x16xf32> to vector<8x8xf32>
    %cst_37 = arith.constant 5.000000e-01 : f32
    %81 = vector.broadcast %cst_37 : f32 to vector<8x8xf32>
    %82 = arith.mulf %81, %80 : vector<8x8xf32>
    %83 = math.exp %82 : vector<8x8xf32>
    %c0_38 = arith.constant 0 : index
    %c0_39 = arith.constant 0 : index
    %84 = vector.load %arg2[%c0_38, %c0_39] : memref<8x8xf32, #tpu.memory_space<vmem>>, vector<8x8xf32>
    %85 = arith.mulf %83, %84 : vector<8x8xf32>
    %86 = arith.addf %85, %79 : vector<8x8xf32>
    %c0_40 = arith.constant 0 : index
    %c0_41 = arith.constant 0 : index
    %87 = vector.load %arg17[%c0_40, %c0_41] : memref<8x256xf32, #tpu.memory_space<vmem>>, vector<8x256xf32>
    %cst_42 = arith.constant dense<0.000000e+00> : vector<8x256xf32>
    %88 = tpu.matmul %86, %87, %cst_42 {dimension_numbers = #tpu.dot_dimension_numbers<[1], [0], [0], [1], [0, 0, 1, 1], [], []>} : vector<8x8xf32>, vector<8x256xf32>, vector<8x256xf32> -> vector<8x256xf32>
    %c0_43 = arith.constant 0 : index
    %c0_44 = arith.constant 0 : index
    %89 = vector.load %arg18[%c0_43, %c0_44] : memref<1x256xf32, #tpu.memory_space<vmem>>, vector<1x256xf32>
    %90 = vector.broadcast %89 : vector<1x256xf32> to vector<8x256xf32>
    %91 = arith.addf %88, %90 : vector<8x256xf32>
    %c0_45 = arith.constant 0 : index
    %c0_46 = arith.constant 0 : index
    %92 = vector.load %arg19[%c0_45, %c0_46] : memref<256x288xf32, #tpu.memory_space<vmem>>, vector<256x288xf32>
    %cst_47 = arith.constant dense<0.000000e+00> : vector<8x288xf32>
    %93 = tpu.matmul %91, %92, %cst_47 {dimension_numbers = #tpu.dot_dimension_numbers<[1], [0], [0], [1], [0, 0, 1, 1], [], []>} : vector<8x256xf32>, vector<256x288xf32>, vector<8x288xf32> -> vector<8x288xf32>
    %94 = arith.mulf %93, %93 : vector<8x288xf32>
    %95 = tpu.concatenate %93, %94 in 0 : vector<8x288xf32>, vector<8x288xf32> -> vector<16x288xf32>
    %c0_48 = arith.constant 0 : index
    %c0_49 = arith.constant 0 : index
    %96 = vector.load %arg9[%c0_48, %c0_49] : memref<288x32xf32, #tpu.memory_space<vmem>>, vector<288x32xf32>
    %cst_50 = arith.constant dense<0.000000e+00> : vector<16x32xf32>
    %97 = tpu.matmul %95, %96, %cst_50 {dimension_numbers = #tpu.dot_dimension_numbers<[1], [0], [0], [1], [0, 0, 1, 1], [], []>} : vector<16x288xf32>, vector<288x32xf32>, vector<16x32xf32> -> vector<16x32xf32>
    %98 = vector.extract_strided_slice %97 {offsets = [0, 0], sizes = [8, 32], strides = [1, 1]} : vector<16x32xf32> to vector<8x32xf32>
    %99 = vector.extract_strided_slice %97 {offsets = [8, 0], sizes = [8, 32], strides = [1, 1]} : vector<16x32xf32> to vector<8x32xf32>
    %100 = arith.mulf %98, %98 : vector<8x32xf32>
    %101 = arith.subf %99, %100 : vector<8x32xf32>
    %cst_51 = arith.constant 9.99999974E-6 : f32
    %102 = vector.broadcast %cst_51 : f32 to vector<8x32xf32>
    %103 = arith.addf %101, %102 : vector<8x32xf32>
    %104 = math.rsqrt %103 : vector<8x32xf32>
    %cst_52 = arith.constant 0.000000e+00 : f32
    %105 = vector.broadcast %cst_52 : f32 to vector<8x32xf32>
    %106 = arith.subf %105, %98 : vector<8x32xf32>
    %107 = arith.mulf %106, %104 : vector<8x32xf32>
    %108 = tpu.concatenate %104, %107 in 0 : vector<8x32xf32>, vector<8x32xf32> -> vector<16x32xf32>
    %c0_53 = arith.constant 0 : index
    %c0_54 = arith.constant 0 : index
    %109 = vector.load %arg10[%c0_53, %c0_54] : memref<32x288xf32, #tpu.memory_space<vmem>>, vector<32x288xf32>
    %cst_55 = arith.constant dense<0.000000e+00> : vector<16x288xf32>
    %110 = tpu.matmul %108, %109, %cst_55 {dimension_numbers = #tpu.dot_dimension_numbers<[1], [0], [0], [1], [0, 0, 1, 1], [], []>} : vector<16x32xf32>, vector<32x288xf32>, vector<16x288xf32> -> vector<16x288xf32>
    %111 = vector.extract_strided_slice %110 {offsets = [0, 0], sizes = [8, 288], strides = [1, 1]} : vector<16x288xf32> to vector<8x288xf32>
    %112 = arith.mulf %93, %111 : vector<8x288xf32>
    %113 = vector.extract_strided_slice %110 {offsets = [8, 0], sizes = [8, 288], strides = [1, 1]} : vector<16x288xf32> to vector<8x288xf32>
    %114 = arith.addf %112, %113 : vector<8x288xf32>
    %cst_56 = arith.constant 0.00999999977 : f32
    %115 = vector.broadcast %cst_56 : f32 to vector<8x288xf32>
    %116 = arith.mulf %115, %114 : vector<8x288xf32>
    %117 = arith.maximumf %114, %116 : vector<8x288xf32>
    %c0_57 = arith.constant 0 : index
    %c0_58 = arith.constant 0 : index
    %118 = vector.load %arg20[%c0_57, %c0_58] : memref<288x272xf32, #tpu.memory_space<vmem>>, vector<288x272xf32>
    %cst_59 = arith.constant dense<0.000000e+00> : vector<8x272xf32>
    %119 = tpu.matmul %117, %118, %cst_59 {dimension_numbers = #tpu.dot_dimension_numbers<[1], [0], [0], [1], [0, 0, 1, 1], [], []>} : vector<8x288xf32>, vector<288x272xf32>, vector<8x272xf32> -> vector<8x272xf32>
    %120 = arith.mulf %119, %119 : vector<8x272xf32>
    %121 = tpu.concatenate %119, %120 in 0 : vector<8x272xf32>, vector<8x272xf32> -> vector<16x272xf32>
    %c0_60 = arith.constant 0 : index
    %c0_61 = arith.constant 0 : index
    %122 = vector.load %arg11[%c0_60, %c0_61] : memref<272x16xf32, #tpu.memory_space<vmem>>, vector<272x16xf32>
    %cst_62 = arith.constant dense<0.000000e+00> : vector<16x16xf32>
    %123 = tpu.matmul %121, %122, %cst_62 {dimension_numbers = #tpu.dot_dimension_numbers<[1], [0], [0], [1], [0, 0, 1, 1], [], []>} : vector<16x272xf32>, vector<272x16xf32>, vector<16x16xf32> -> vector<16x16xf32>
    %124 = vector.extract_strided_slice %123 {offsets = [0, 0], sizes = [8, 16], strides = [1, 1]} : vector<16x16xf32> to vector<8x16xf32>
    %125 = vector.extract_strided_slice %123 {offsets = [8, 0], sizes = [8, 16], strides = [1, 1]} : vector<16x16xf32> to vector<8x16xf32>
    %126 = arith.mulf %124, %124 : vector<8x16xf32>
    %127 = arith.subf %125, %126 : vector<8x16xf32>
    %cst_63 = arith.constant 9.99999974E-6 : f32
    %128 = vector.broadcast %cst_63 : f32 to vector<8x16xf32>
    %129 = arith.addf %127, %128 : vector<8x16xf32>
    %130 = math.rsqrt %129 : vector<8x16xf32>
    %cst_64 = arith.constant 0.000000e+00 : f32
    %131 = vector.broadcast %cst_64 : f32 to vector<8x16xf32>
    %132 = arith.subf %131, %124 : vector<8x16xf32>
    %133 = arith.mulf %132, %130 : vector<8x16xf32>
    %134 = tpu.concatenate %130, %133 in 0 : vector<8x16xf32>, vector<8x16xf32> -> vector<16x16xf32>
    %c0_65 = arith.constant 0 : index
    %c0_66 = arith.constant 0 : index
    %135 = vector.load %arg12[%c0_65, %c0_66] : memref<16x272xf32, #tpu.memory_space<vmem>>, vector<16x272xf32>
    %cst_67 = arith.constant dense<0.000000e+00> : vector<16x272xf32>
    %136 = tpu.matmul %134, %135, %cst_67 {dimension_numbers = #tpu.dot_dimension_numbers<[1], [0], [0], [1], [0, 0, 1, 1], [], []>} : vector<16x16xf32>, vector<16x272xf32>, vector<16x272xf32> -> vector<16x272xf32>
    %137 = vector.extract_strided_slice %136 {offsets = [0, 0], sizes = [8, 272], strides = [1, 1]} : vector<16x272xf32> to vector<8x272xf32>
    %138 = arith.mulf %119, %137 : vector<8x272xf32>
    %139 = vector.extract_strided_slice %136 {offsets = [8, 0], sizes = [8, 272], strides = [1, 1]} : vector<16x272xf32> to vector<8x272xf32>
    %140 = arith.addf %138, %139 : vector<8x272xf32>
    %cst_68 = arith.constant 0.00999999977 : f32
    %141 = vector.broadcast %cst_68 : f32 to vector<8x272xf32>
    %142 = arith.mulf %141, %140 : vector<8x272xf32>
    %143 = arith.maximumf %140, %142 : vector<8x272xf32>
    %c0_69 = arith.constant 0 : index
    %c0_70 = arith.constant 0 : index
    %144 = vector.load %arg21[%c0_69, %c0_70] : memref<272x64xf32, #tpu.memory_space<vmem>>, vector<272x64xf32>
    %cst_71 = arith.constant dense<0.000000e+00> : vector<8x64xf32>
    %145 = tpu.matmul %143, %144, %cst_71 {dimension_numbers = #tpu.dot_dimension_numbers<[1], [0], [0], [1], [0, 0, 1, 1], [], []>} : vector<8x272xf32>, vector<272x64xf32>, vector<8x64xf32> -> vector<8x64xf32>
    %c0_72 = arith.constant 0 : index
    %c0_73 = arith.constant 0 : index
    %146 = vector.load %arg22[%c0_72, %c0_73] : memref<1x64xf32, #tpu.memory_space<vmem>>, vector<1x64xf32>
    %147 = vector.broadcast %146 : vector<1x64xf32> to vector<8x64xf32>
    %148 = arith.addf %145, %147 : vector<8x64xf32>
    %149 = math.tanh %148 : vector<8x64xf32>
    %c0_74 = arith.constant 0 : index
    %c0_75 = arith.constant 0 : index
    %150 = vector.load %arg23[%c0_74, %c0_75] : memref<8x64xf32, #tpu.memory_space<vmem>>, vector<8x64xf32>
    tpu.vector_store %arg23[%c0_74, %c0_75], %149 {strides = array<i32>} : memref<8x64xf32, #tpu.memory_space<vmem>>, vector<8x64xf32>,
    %151 = arith.subf %149, %0 : vector<8x64xf32>
    %152 = arith.mulf %151, %151 : vector<8x64xf32>
    %cst_76 = arith.constant dense<0.000000e+00> : vector<8xf32>
    %153 = vector.multi_reduction <add>, %152, %cst_76 [1] : vector<8x64xf32> to vector<8xf32>
    %154 = vector.shape_cast %153 : vector<8xf32> to vector<8x1xf32>
    %cst_77 = arith.constant 1.000000e+00 : f32
    %155 = vector.broadcast %cst_77 : f32 to vector<8x8xf32>
    %156 = arith.addf %155, %80 : vector<8x8xf32>
    %157 = arith.mulf %79, %79 : vector<8x8xf32>
    %158 = arith.subf %156, %157 : vector<8x8xf32>
    %159 = arith.mulf %83, %83 : vector<8x8xf32>
    %160 = arith.subf %158, %159 : vector<8x8xf32>
    %cst_78 = arith.constant dense<0.000000e+00> : vector<8xf32>
    %161 = vector.multi_reduction <add>, %160, %cst_78 [1] : vector<8x8xf32> to vector<8xf32>
    %162 = vector.shape_cast %161 : vector<8xf32> to vector<8x1xf32>
    %cst_79 = arith.constant -5.000000e-01 : f32
    %163 = vector.broadcast %cst_79 : f32 to vector<8x1xf32>
    %164 = arith.mulf %163, %162 : vector<8x1xf32>
    %c0_80 = arith.constant 0 : index
    %c0_81 = arith.constant 0 : index
    %165 = vector.load %arg24[%c0_80, %c0_81] : memref<8x18xf32, #tpu.memory_space<vmem>>, vector<8x16xf32>
    tpu.vector_store %arg24[%c0_80, %c0_81], %78 {strides = array<i32>} : memref<8x18xf32, #tpu.memory_space<vmem>>, vector<8x16xf32>,
    %c0_82 = arith.constant 0 : index
    %c16 = arith.constant 16 : index
    %166 = vector.load %arg24[%c0_82, %c16] : memref<8x18xf32, #tpu.memory_space<vmem>>, vector<8x1xf32>
    tpu.vector_store %arg24[%c0_82, %c16], %154 {strides = array<i32>} : memref<8x18xf32, #tpu.memory_space<vmem>>, vector<8x1xf32>,
    %c0_83 = arith.constant 0 : index
    %c17 = arith.constant 17 : index
    %167 = vector.load %arg24[%c0_83, %c17] : memref<8x18xf32, #tpu.memory_space<vmem>>, vector<8x1xf32>
    tpu.vector_store %arg24[%c0_83, %c17], %164 {strides = array<i32>} : memref<8x18xf32, #tpu.memory_space<vmem>>, vector<8x1xf32>,
    return
  }
  func.func @transform_0(%arg0: i32) -> (i32, i32) {
    %c0_i32 = arith.constant 0 : i32
    %c0_i32_0 = arith.constant 0 : i32
    return %arg0, %c0_i32 : i32, i32
  }
  func.func @transform_1(%arg0: i32) -> (i32, i32) {
    %c0_i32 = arith.constant 0 : i32
    %c0_i32_0 = arith.constant 0 : i32
    return %arg0, %c0_i32 : i32, i32
  }
  func.func @transform_2(%arg0: i32) -> (i32, i32) {
    %c0_i32 = arith.constant 0 : i32
    %c0_i32_0 = arith.constant 0 : i32
    %c0_i32_1 = arith.constant 0 : i32
    return %c0_i32, %c0_i32_0 : i32, i32
  }
  func.func @transform_3(%arg0: i32) -> (i32, i32) {
    %c0_i32 = arith.constant 0 : i32
    %c0_i32_0 = arith.constant 0 : i32
    %c0_i32_1 = arith.constant 0 : i32
    return %c0_i32, %c0_i32_0 : i32, i32
  }
  func.func @transform_4(%arg0: i32) -> (i32, i32) {
    %c0_i32 = arith.constant 0 : i32
    %c0_i32_0 = arith.constant 0 : i32
    %c0_i32_1 = arith.constant 0 : i32
    return %c0_i32, %c0_i32_0 : i32, i32
  }
  func.func @transform_5(%arg0: i32) -> (i32, i32) {
    %c0_i32 = arith.constant 0 : i32
    %c0_i32_0 = arith.constant 0 : i32
    %c0_i32_1 = arith.constant 0 : i32
    return %c0_i32, %c0_i32_0 : i32, i32
  }
  func.func @transform_6(%arg0: i32) -> (i32, i32) {
    %c0_i32 = arith.constant 0 : i32
    %c0_i32_0 = arith.constant 0 : i32
    %c0_i32_1 = arith.constant 0 : i32
    return %c0_i32, %c0_i32_0 : i32, i32
  }
  func.func @transform_7(%arg0: i32) -> (i32, i32) {
    %c0_i32 = arith.constant 0 : i32
    %c0_i32_0 = arith.constant 0 : i32
    %c0_i32_1 = arith.constant 0 : i32
    return %c0_i32, %c0_i32_0 : i32, i32
  }
  func.func @transform_8(%arg0: i32) -> (i32, i32) {
    %c0_i32 = arith.constant 0 : i32
    %c0_i32_0 = arith.constant 0 : i32
    %c0_i32_1 = arith.constant 0 : i32
    return %c0_i32, %c0_i32_0 : i32, i32
  }
  func.func @transform_9(%arg0: i32) -> (i32, i32) {
    %c0_i32 = arith.constant 0 : i32
    %c0_i32_0 = arith.constant 0 : i32
    %c0_i32_1 = arith.constant 0 : i32
    return %c0_i32, %c0_i32_0 : i32, i32
  }
  func.func @transform_10(%arg0: i32) -> (i32, i32) {
    %c0_i32 = arith.constant 0 : i32
    %c0_i32_0 = arith.constant 0 : i32
    %c0_i32_1 = arith.constant 0 : i32
    return %c0_i32, %c0_i32_0 : i32, i32
  }
  func.func @transform_11(%arg0: i32) -> (i32, i32) {
    %c0_i32 = arith.constant 0 : i32
    %c0_i32_0 = arith.constant 0 : i32
    %c0_i32_1 = arith.constant 0 : i32
    return %c0_i32, %c0_i32_0 : i32, i32
  }
  func.func @transform_12(%arg0: i32) -> (i32, i32) {
    %c0_i32 = arith.constant 0 : i32
    %c0_i32_0 = arith.constant 0 : i32
    %c0_i32_1 = arith.constant 0 : i32
    return %c0_i32, %c0_i32_0 : i32, i32
  }
  func.func @transform_13(%arg0: i32) -> (i32, i32) {
    %c0_i32 = arith.constant 0 : i32
    %c0_i32_0 = arith.constant 0 : i32
    %c0_i32_1 = arith.constant 0 : i32
    return %c0_i32, %c0_i32_0 : i32, i32
  }
  func.func @transform_14(%arg0: i32) -> (i32, i32) {
    %c0_i32 = arith.constant 0 : i32
    %c0_i32_0 = arith.constant 0 : i32
    %c0_i32_1 = arith.constant 0 : i32
    return %c0_i32, %c0_i32_0 : i32, i32
  }
  func.func @transform_15(%arg0: i32) -> (i32, i32) {
    %c0_i32 = arith.constant 0 : i32
    %c0_i32_0 = arith.constant 0 : i32
    %c0_i32_1 = arith.constant 0 : i32
    return %c0_i32, %c0_i32_0 : i32, i32
  }
  func.func @transform_16(%arg0: i32) -> (i32, i32) {
    %c0_i32 = arith.constant 0 : i32
    %c0_i32_0 = arith.constant 0 : i32
    %c0_i32_1 = arith.constant 0 : i32
    return %c0_i32, %c0_i32_0 : i32, i32
  }
  func.func @transform_17(%arg0: i32) -> (i32, i32) {
    %c0_i32 = arith.constant 0 : i32
    %c0_i32_0 = arith.constant 0 : i32
    %c0_i32_1 = arith.constant 0 : i32
    return %c0_i32, %c0_i32_0 : i32, i32
  }
  func.func @transform_18(%arg0: i32) -> (i32, i32) {
    %c0_i32 = arith.constant 0 : i32
    %c0_i32_0 = arith.constant 0 : i32
    %c0_i32_1 = arith.constant 0 : i32
    return %c0_i32, %c0_i32_0 : i32, i32
  }
  func.func @transform_19(%arg0: i32) -> (i32, i32) {
    %c0_i32 = arith.constant 0 : i32
    %c0_i32_0 = arith.constant 0 : i32
    %c0_i32_1 = arith.constant 0 : i32
    return %c0_i32, %c0_i32_0 : i32, i32
  }
  func.func @transform_20(%arg0: i32) -> (i32, i32) {
    %c0_i32 = arith.constant 0 : i32
    %c0_i32_0 = arith.constant 0 : i32
    %c0_i32_1 = arith.constant 0 : i32
    return %c0_i32, %c0_i32_0 : i32, i32
  }
  func.func @transform_21(%arg0: i32) -> (i32, i32) {
    %c0_i32 = arith.constant 0 : i32
    %c0_i32_0 = arith.constant 0 : i32
    %c0_i32_1 = arith.constant 0 : i32
    return %c0_i32, %c0_i32_0 : i32, i32
  }
  func.func @transform_22(%arg0: i32) -> (i32, i32) {
    %c0_i32 = arith.constant 0 : i32
    %c0_i32_0 = arith.constant 0 : i32
    return %arg0, %c0_i32 : i32, i32
  }
  func.func @transform_23(%arg0: i32) -> (i32, i32) {
    %c0_i32 = arith.constant 0 : i32
    %c0_i32_0 = arith.constant 0 : i32
    return %arg0, %c0_i32 : i32, i32
  }
}

</mosaic_0001>

<bundles_post_ra>
// kernel: vae_forward.1
= control target key start
LH: loop header
LB: loop body
LE: loop exit
PB: predicated region body
PF: predicated region fallthrough
CT: control target
= control target key end

     0   :  { %s5893_s0 = inlined_call_operand.vmem [shape: f32[16,64], index: 0, kind: input, shape index: {}]   ;;  %s5894_s1 = inlined_call_operand.vmem [shape: f32[16,8], index: 1, kind: input, shape index: {}]   ;;  %s5895_s2 = inlined_call_operand.vmem [shape: f32[64,4], index: 2, kind: input, shape index: {}]   ;;  %s5896_s3 = inlined_call_operand.vmem [shape: f32[4,64], index: 3, kind: input, shape index: {}]   ;;  %s5897_s4 = inlined_call_operand.vmem [shape: f32[256,32], index: 4, kind: input, shape index: {}]   ;;  %s5898_s5 = inlined_call_operand.vmem [shape: f32[32,256], index: 5, kind: input, shape index: {}]   ;;  %s5899_s6 = inlined_call_operand.vmem [shape: f32[256,64], index: 6, kind: input, shape index: {}]   ;;  %s5900_s7 = inlined_call_operand.vmem [shape: f32[64,256], index: 7, kind: input, shape index: {}]   ;;  %s5901_s8 = inlined_call_operand.vmem [shape: f32[288,32], index: 8, kind: input, shape index: {}]   ;;  %s5902_s9 = inlined_call_operand.vmem [shape: f32[32,288], index: 9, kind: input, shape index: {}]   ;;  %s5903_s10 = inlined_call_operand.vmem [shape: f32[272,16], index: 10, kind: input, shape index: {}]   ;;  %s5904_s11 = inlined_call_operand.vmem [shape: f32[16,272], index: 11, kind: input, shape index: {}]   ;;  %s5905_s12 = inlined_call_operand.vmem [shape: f32[64,256], index: 12, kind: input, shape index: {}]   ;;  %s5906_s13 = inlined_call_operand.vmem [shape: f32[256,256], index: 13, kind: input, shape index: {}]   ;;  %s5907_s14 = inlined_call_operand.vmem [shape: f32[256,16], index: 14, kind: input, shape index: {}]   ;;  %s5908_s15 = inlined_call_operand.vmem [shape: f32[1,16], index: 15, kind: input, shape index: {}]   ;;  %s5909_s16 = inlined_call_operand.vmem [shape: f32[8,256], index: 16, kind: input, shape index: {}]   ;;  %s5910_s17 = inlined_call_operand.vmem [shape: f32[1,256], index: 17, kind: input, shape index: {}]   ;;  %s5911_s18 = inlined_call_operand.vmem [shape: f32[256,288], index: 18, kind: input, shape index: {}]   ;;  %s5912_s19 = inlined_call_operand.vmem [shape: f32[288,272], index: 19, kind: input, shape index: {}]   ;;  %s5913_s20 = inlined_call_operand.vmem [shape: f32[272,64], index: 20, kind: input, shape index: {}]   ;;  %s5914_s21 = inlined_call_operand.vmem [shape: f32[1,64], index: 21, kind: input, shape index: {}]   ;;  %s5915_s22 = inlined_call_operand.vmem [shape: f32[16,64], index: 22, kind: output, shape index: {0}]   ;;  %s5916_s23 = inlined_call_operand.vmem [shape: f32[16,18], index: 23, kind: output, shape index: {1}]  }
   0x1   :  { %5927 = sst [smem:[#allocation2_spill]] %s5893_s0 }
   0x2   :  { %5928 = sst [smem:[#allocation3_spill]] %s5894_s1 }
   0x3   :  { %5929 = sst [smem:[#allocation4_spill]] %s5895_s2 }
   0x4   :  { %5930 = sst [smem:[#allocation5_spill]] %s5896_s3 }
   0x5   :  { %5931 = sst [smem:[#allocation6_spill]] %s5897_s4  ;;  %s4104_s4 = smov 0  }
   0x6   :  { %5932 = sst [smem:[#allocation7_spill]] %s5898_s5 }
   0x7   :  { %5933 = sst [smem:[#allocation8_spill]] %s5899_s6 }
   0x8   :  { %5934 = sst [smem:[#allocation9_spill]] %s5900_s7 }
   0x9   :  { %5935 = sst [smem:[#allocation10_spill]] %s5905_s12 }
   0xa LB: > { %s3495_s30 = sadd.s32 4294967295, %s3978_s4   ;;  %p3499_p0 = scmp.ge.s32.totalorder %s3978_s4, 1  ;;  %s3978_s4 = sphi %s4104_s4, %s34_s4  }
   0xb   : > { %p648_p1 = scmp.lt.s32.totalorder %s3978_s4, 3 }
   0xd   : > { %p649_p2 = pnand %p3499_p0, %p648_p1 }
   0xe   : > { %s5936_s5 = sld [smem:[#allocation4_spill]] (!%p649_p2)  ;;  %p718_p3 = scmp.lt.s32.totalorder (!%p649_p2), %s3495_s30, 1 }
   0xf   : > { %652 = sbr.rel (%p649_p2) target bundleno = 3972 (0xf84), region = 108  ;;  %s5937_s0 = sld [smem:[#allocation2_spill]] (!%p649_p2) }
  0x10   : > { %s5939_s12 = sld [smem:[#allocation10_spill]] (!%p649_p2) }
  0x11   : > { %s5940_s1 = sld [smem:[#allocation6_spill]] (!%p649_p2) }
  0x12   : > { %s5941_s27 = sld [smem:[#allocation7_spill]] (!%p649_p2) }
  0x13   : > { %s5943_s2 = sld [smem:[#allocation9_spill]] (!%p649_p2) }
  0x14   : > { %v743_v0 = vld [vmem:[%s5936_s5 + $0x38] sm:$0xff]  ;;  %v742_v1 = vld [vmem:[%s5936_s5 + $0x30] sm:$0xff]  ;;  %v741_v2 = vld [vmem:[%s5936_s5 + $0x28] sm:$0xff]  ;;  %s5947_s30 = smov (!%p718_p3, %s3495_s30), 1  ;;  %vm744_vm0 = vcmask 523264   ;;  %vm840_vm1 = vcmask 1043456  }
  0x15   : > { %3867 = vmatprep.subr.mxu0 %v743_v0  ;;  %v740_v3 = vld [vmem:[%s5936_s5 + $0x20] sm:$0xff]  ;;  %s4124_s28 = sshll.u32 %s5947_s30, 3  ;;  %v739_v4 = vld [vmem:[%s5936_s5 + $0x18] sm:$0xff]  ;;  %v738_v6 = vld [vmem:[%s5936_s5 + $0x10] sm:$0xff]  ;;  %vm833_vm2 = vcmask 31744   ;;  %v3980_v35 = vmov 0.0  }
  0x16   : > { %3868 = vmatpush3.msra.mxu0 %v743_v0  ;;  %s4130_s24 = scalar_lea.vmem %s5937_s0, %s4124_s28  ;;  %v737_v7 = vld [vmem:[%s5936_s5 + $0x8] sm:$0xff]  ;;  %v736_v8 = vld [vmem:[%s5936_s5] sm:$0xff]  ;;  %s5938_s0 = sld [smem:[#allocation5_spill]]  ;;  %v936_v11 = vld [vmem:[%s5939_s12 + $0x78] sm:$0xff]  ;;  %vm1134_vm3 = vcmask 261120   ;;  %vm2847_vm4 = vcmask 130048  }
  0x17   : > { %3869 = vmatprep.subr.mxu0 %v742_v1  ;;  %v4136_v5 = vld [vmem:[%s4130_s24] sm:$0xff]  ;;  %v935_v20 = vld [vmem:[%s5939_s12 + $0x70] sm:$0xff]  ;;  %v934_v21 = vld [vmem:[%s5939_s12 + $0x68] sm:$0xff]  ;;  %vm1723_vm5 = vcmask 64512   ;;  %s5945_s5 = smov 120   ;;  %vm3983_vm6 = vmmov 0   ;;  %s729_s7 = scalar_lea.vmem %s5915_s22, %s4124_s28 }
  0x18   : > { %3870 = vmatpush3.msra.mxu0 %v742_v1  ;;  %3883 = vmatprep.mubr.msk.f32.mxu0 %vm744_vm0, %v4136_v5  ;;  %v735_v9 = vmul.f32 %v4136_v5, %v4136_v5  ;;  %v933_v22 = vld [vmem:[%s5939_s12 + $0x60] sm:$0xff]  ;;  %v932_v23 = vld [vmem:[%s5939_s12 + $0x58] sm:$0xff]  ;;  %v931_v24 = vld [vmem:[%s5939_s12 + $0x50] sm:$0xff]  ;;  %vm3395_vm7 = vcmask 138368   ;;  %vm3397_vm8 = vcmask 146568  }
  0x19   : > { %3871 = vmatprep.subr.mxu0 %v741_v2  ;;  %v930_v25 = vld [vmem:[%s5939_s12 + $0x48] sm:$0xff]  ;;  %v929_v26 = vld [vmem:[%s5939_s12 + $0x40] sm:$0xff]  ;;  %v928_v27 = vld [vmem:[%s5939_s12 + $0x38] sm:$0xff] }
  0x1a   : > { %3872 = vmatpush3.msra.mxu0 %v741_v2  ;;  %v927_v28 = vld [vmem:[%s5939_s12 + $0x30] sm:$0xff]  ;;  %v926_v29 = vld [vmem:[%s5939_s12 + $0x28] sm:$0xff]  ;;  %v925_v30 = vld [vmem:[%s5939_s12 + $0x20] sm:$0xff] }
  0x1b   : > { %3873 = vmatprep.subr.mxu0 %v740_v3  ;;  %v924_v31 = vld [vmem:[%s5939_s12 + $0x18] sm:$0xff]  ;;  %v923_v32 = vld [vmem:[%s5939_s12 + $0x10] sm:$0xff]  ;;  %v922_v33 = vld [vmem:[%s5939_s12 + $0x8] sm:$0xff] }
  0x1c   : > { %3874 = vmatpush3.msra.mxu0 %v740_v3  ;;  %v832_v10 = vld [vmem:[%s5938_s0] sm:$0xf]  ;;  %v1044_v36 = vld [vmem:[%s5940_s1 + $0xf8] sm:$0xff]  ;;  %v1043_v38 = vld [vmem:[%s5940_s1 + $0xf0] sm:$0xff] }
  0x1d   : > { %3875 = vmatprep.subr.mxu0 %v739_v4  ;;  %3886 = vmatprep.subr.msk.mxu1 %vm840_vm1, %v832_v10  ;;  %v921_v34 = vld [vmem:[%s5939_s12] sm:$0xff]  ;;  %v1028_v37 = vld [vmem:[%s5940_s1 + $0x78] sm:$0xff]  ;;  %v1027_v39 = vld [vmem:[%s5940_s1 + $0x70] sm:$0xff] }
  0x1e   : > { %3876 = vmatpush3.msra.mxu0 %v739_v4  ;;  %3887 = vmatpush3.msk.msra.mxu1 %vm840_vm1, %v832_v10  ;;  %v1042_v40 = vld [vmem:[%s5940_s1 + $0xe8] sm:$0xff]  ;;  %v1041_v42 = vld [vmem:[%s5940_s1 + $0xe0] sm:$0xff]  ;;  %v1040_v44 = vld [vmem:[%s5940_s1 + $0xd8] sm:$0xff] }
  0x1f   : > { %3877 = vmatprep.subr.mxu0 %v738_v6  ;;  %956 = vmatprep.subr.mxu1 %v936_v11  ;;  %v1026_v41 = vld [vmem:[%s5940_s1 + $0x68] sm:$0xff]  ;;  %v1025_v43 = vld [vmem:[%s5940_s1 + $0x60] sm:$0xff]  ;;  %v1024_v45 = vld [vmem:[%s5940_s1 + $0x58] sm:$0xff] }
  0x20   : > { %3878 = vmatpush3.msra.mxu0 %v738_v6  ;;  %v1039_v46 = vld [vmem:[%s5940_s1 + $0xd0] sm:$0xff]  ;;  %v1038_v48 = vld [vmem:[%s5940_s1 + $0xc8] sm:$0xff]  ;;  %v1037_v50 = vld [vmem:[%s5940_s1 + $0xc0] sm:$0xff] }
  0x21   : > { %3879 = vmatprep.subr.mxu0 %v737_v7  ;;  %v1023_v47 = vld [vmem:[%s5940_s1 + $0x50] sm:$0xff]  ;;  %v1022_v49 = vld [vmem:[%s5940_s1 + $0x48] sm:$0xff]  ;;  %v1021_v51 = vld [vmem:[%s5940_s1 + $0x40] sm:$0xff] }
  0x22   : > { %3880 = vmatpush3.msra.mxu0 %v737_v7  ;;  %v1036_v52 = vld [vmem:[%s5940_s1 + $0xb8] sm:$0xff]  ;;  %v1035_v54 = vld [vmem:[%s5940_s1 + $0xb0] sm:$0xff]  ;;  %v1034_v56 = vld [vmem:[%s5940_s1 + $0xa8] sm:$0xff] }
  0x23   : > { %3881 = vmatprep.subr.mxu0 %v736_v8  ;;  %v1020_v53 = vld [vmem:[%s5940_s1 + $0x38] sm:$0xff]  ;;  %v1019_v55 = vld [vmem:[%s5940_s1 + $0x30] sm:$0xff]  ;;  %v1018_v57 = vld [vmem:[%s5940_s1 + $0x28] sm:$0xff] }
  0x24   : > { %3882 = vmatpush3.msra.mxu0 %v736_v8  ;;  %v1033_v58 = vld [vmem:[%s5940_s1 + $0xa0] sm:$0xff]  ;;  %v1032_v60 = vld [vmem:[%s5940_s1 + $0x98] sm:$0xff]  ;;  %v1031_v62 = vld [vmem:[%s5940_s1 + $0x90] sm:$0xff] }
  0x25   : > { %3884 = vmatmul.mubr.msk.f32.vlgmr.msra.gmra.mxu0 %vm744_vm0, %v735_v9  ;;  %3547 = vmatprep.subr.mxu0 %v1044_v36  ;;  %v1017_v59 = vld [vmem:[%s5940_s1 + $0x20] sm:$0xff]  ;;  %v1016_v61 = vld [vmem:[%s5940_s1 + $0x18] sm:$0xff]  ;;  %v1015_v63 = vld [vmem:[%s5940_s1 + $0x10] sm:$0xff] }
  0x26   : > { %3548 = vmatpush3.msra.mxu0 %v1028_v37  ;;  %v1030_v4 = vld [vmem:[%s5940_s1 + $0x88] sm:$0xff]  ;;  %v1029_v7 = vld [vmem:[%s5940_s1 + $0x80] sm:$0xff]  ;;  %v1241_v37 = vld [vmem:[%s5906_s13 + $0x78] sm:$0xff] }
  0x27   : > { %3549 = vmatprep.subr.mxu0 %v1043_v38  ;;  %v1014_v6 = vld [vmem:[%s5940_s1 + $0x8] sm:$0xff]  ;;  %v1242_v36 = vld [vmem:[%s5906_s13 + $0x80] sm:$0xff]  ;;  %v1240_v38 = vld [vmem:[%s5906_s13 + $0x70] sm:$0xff] }
  0x28   : > { %3550 = vmatpush3.msra.mxu0 %v1027_v39  ;;  %v1239_v39 = vld [vmem:[%s5906_s13 + $0x68] sm:$0xff] }
  0x29   : > { %3551 = vmatprep.subr.mxu0 %v1042_v40  ;;  %v1238_v40 = vld [vmem:[%s5906_s13 + $0x60] sm:$0xff] }
  0x2a   : > { %3552 = vmatpush3.msra.mxu0 %v1026_v41  ;;  %v1237_v41 = vld [vmem:[%s5906_s13 + $0x58] sm:$0xff] }
  0x2b   : > { %3553 = vmatprep.subr.mxu0 %v1041_v42  ;;  %v1236_v42 = vld [vmem:[%s5906_s13 + $0x50] sm:$0xff] }
  0x2c   : > { %3554 = vmatpush3.msra.mxu0 %v1025_v43  ;;  %v1235_v43 = vld [vmem:[%s5906_s13 + $0x48] sm:$0xff] }
  0x2d   : > { %3555 = vmatprep.subr.mxu0 %v1040_v44  ;;  %v1234_v44 = vld [vmem:[%s5906_s13 + $0x40] sm:$0xff] }
  0x2e   : > { %3556 = vmatpush3.msra.mxu0 %v1024_v45  ;;  %v1233_v45 = vld [vmem:[%s5906_s13 + $0x38] sm:$0xff] }
  0x2f   : > { %3557 = vmatprep.subr.mxu0 %v1039_v46  ;;  %v1232_v46 = vld [vmem:[%s5906_s13 + $0x30] sm:$0xff] }
  0x30   : > { %3558 = vmatpush3.msra.mxu0 %v1023_v47  ;;  %v1231_v47 = vld [vmem:[%s5906_s13 + $0x28] sm:$0xff] }
  0x31   : > { %3559 = vmatprep.subr.mxu0 %v1038_v48  ;;  %v1230_v48 = vld [vmem:[%s5906_s13 + $0x20] sm:$0xff] }
  0x32   : > { %3560 = vmatpush3.msra.mxu0 %v1022_v49  ;;  %v1229_v49 = vld [vmem:[%s5906_s13 + $0x18] sm:$0xff] }
  0x33   : > { %3561 = vmatprep.subr.mxu0 %v1037_v50  ;;  %v1228_v50 = vld [vmem:[%s5906_s13 + $0x10] sm:$0xff] }
  0x34   : > { %3562 = vmatpush3.msra.mxu0 %v1021_v51  ;;  %v1227_v51 = vld [vmem:[%s5906_s13 + $0x8] sm:$0xff] }
  0x35   : > { %3563 = vmatprep.subr.mxu0 %v1036_v52  ;;  %v1226_v52 = vld [vmem:[%s5906_s13] sm:$0xff] }
  0x36   : > { %3564 = vmatpush3.msra.mxu0 %v1020_v53  ;;  %v1289_v53 = vld [vmem:[%s5906_s13 + $0x1f8] sm:$0xff] }
  0x37   : > { %3565 = vmatprep.subr.mxu0 %v1035_v54  ;;  %v1288_v54 = vld [vmem:[%s5906_s13 + $0x1f0] sm:$0xff] }
  0x38   : > { %3566 = vmatpush3.msra.mxu0 %v1019_v55  ;;  %v1287_v55 = vld [vmem:[%s5906_s13 + $0x1e8] sm:$0xff] }
  0x39   : > { %3567 = vmatprep.subr.mxu0 %v1034_v56  ;;  %v1286_v56 = vld [vmem:[%s5906_s13 + $0x1e0] sm:$0xff] }
  0x3a   : > { %3568 = vmatpush3.msra.mxu0 %v1018_v57  ;;  %v1285_v57 = vld [vmem:[%s5906_s13 + $0x1d8] sm:$0xff] }
  0x3b   : > { %3569 = vmatprep.subr.mxu0 %v1033_v58  ;;  %v1284_v58 = vld [vmem:[%s5906_s13 + $0x1d0] sm:$0xff] }
  0x3c   : > { %3570 = vmatpush3.msra.mxu0 %v1017_v59  ;;  %v1283_v59 = vld [vmem:[%s5906_s13 + $0x1c8] sm:$0xff] }
  0x3d   : > { %3571 = vmatprep.subr.mxu0 %v1032_v60  ;;  %v1282_v60 = vld [vmem:[%s5906_s13 + $0x1c0] sm:$0xff] }
  0x3e   : > { %3572 = vmatpush3.msra.mxu0 %v1016_v61  ;;  %v1281_v61 = vld [vmem:[%s5906_s13 + $0x1b8] sm:$0xff] }
  0x3f   : > { %3573 = vmatprep.subr.mxu0 %v1031_v62  ;;  %v1280_v62 = vld [vmem:[%s5906_s13 + $0x1b0] sm:$0xff] }
  0x40   : > { %3574 = vmatpush3.msra.mxu0 %v1015_v63  ;;  %v1279_v63 = vld [vmem:[%s5906_s13 + $0x1a8] sm:$0xff] }
  0x41   : > { %3575 = vmatprep.subr.mxu0 %v1030_v4  ;;  %v1274_v4 = vld [vmem:[%s5906_s13 + $0x180] sm:$0xff] }
  0x42   : > { %3576 = vmatpush3.msra.mxu0 %v1014_v6  ;;  %v1273_v6 = vld [vmem:[%s5906_s13 + $0x178] sm:$0xff] }
  0x43   : > { %3577 = vmatprep.subr.mxu0 %v1029_v7  ;;  %v1272_v7 = vld [vmem:[%s5906_s13 + $0x170] sm:$0xff] }
  0xe5   : > { %v3885_v12 = vpop.f32.mrf.mxu0 }
  0xe7   : > { %v817_v13 = vpop.f32.mrf.mxu0 }
  0xe8   : > { %v826_v14 = vmul.f32 %v817_v13, %v817_v13  ;;  %v830_v17 = vsub.f32 0.0, %v817_v13  ;;  %v1132_v13 = vld [vmem:[%s5941_s27 + $0x30] sm:$0xff] }
  0xea   : > { %v827_v15 = vsub.f32 %v3885_v12, %v826_v14  ;;  %v1133_v12 = vld [vmem:[%s5941_s27 + $0x38] sm:$0xff]  ;;  %v1131_v14 = vld [vmem:[%s5941_s27 + $0x28] sm:$0xff] }
  0xec   : > { %v828_v16 = vadd.f32 1e-05, %v827_v15  ;;  %v1130_v15 = vld [vmem:[%s5941_s27 + $0x20] sm:$0xff] }
  0xee   : > { %3957 = vrsqrt.f32 %v828_v16  ;;  %v1129_v16 = vld [vmem:[%s5941_s27 + $0x18] sm:$0xff] }
  0xfb   : > { %v3958_v18 = vpop.eup %3957 }
  0xfc   : > { %v831_v19 = vmul.f32 %v3958_v18, %v830_v17  ;;  %3888 = vmatprep.mubr.msk.f32.mxu1 %vm833_vm2, %v3958_v18  ;;  %v1128_v17 = vld [vmem:[%s5941_s27 + $0x10] sm:$0xff]  ;;  %v1127_v18 = vld [vmem:[%s5941_s27 + $0x8] sm:$0xff] }
  0xfe   : > { %3889 = vmatmul.mubr.msk.f32.vlgmr.msra.gmra.mxu1 %vm833_vm2, %v831_v19  ;;  %v1126_v19 = vld [vmem:[%s5941_s27] sm:$0xff] }
  0xff   : > { %957 = vmatpush1.msra.mxu1 %v935_v20  ;;  %1004 = vmatprep.mubr.f32.mxu1 %v3980_v35  ;;  %v1257_v20 = vld [vmem:[%s5906_s13 + $0xf8] sm:$0xff] }
 0x100   : > { %958 = vmatprep.subr.mxu1 %v934_v21  ;;  %v1256_v21 = vld [vmem:[%s5906_s13 + $0xf0] sm:$0xff] }
 0x101   : > { %959 = vmatpush1.msra.mxu1 %v933_v22  ;;  %v1255_v22 = vld [vmem:[%s5906_s13 + $0xe8] sm:$0xff] }
 0x102   : > { %960 = vmatprep.subr.mxu1 %v932_v23  ;;  %v1254_v23 = vld [vmem:[%s5906_s13 + $0xe0] sm:$0xff] }
 0x103   : > { %961 = vmatpush1.msra.mxu1 %v931_v24  ;;  %v1253_v24 = vld [vmem:[%s5906_s13 + $0xd8] sm:$0xff] }
 0x104   : > { %962 = vmatprep.subr.mxu1 %v930_v25  ;;  %v1252_v25 = vld [vmem:[%s5906_s13 + $0xd0] sm:$0xff] }
 0x105   : > { %963 = vmatpush1.msra.mxu1 %v929_v26  ;;  %v1251_v26 = vld [vmem:[%s5906_s13 + $0xc8] sm:$0xff] }
 0x106   : > { %964 = vmatprep.subr.mxu1 %v928_v27  ;;  %v1250_v27 = vld [vmem:[%s5906_s13 + $0xc0] sm:$0xff] }
 0x107   : > { %965 = vmatpush1.msra.mxu1 %v927_v28  ;;  %v1249_v28 = vld [vmem:[%s5906_s13 + $0xb8] sm:$0xff] }
 0x108   : > { %966 = vmatprep.subr.mxu1 %v926_v29  ;;  %v1248_v29 = vld [vmem:[%s5906_s13 + $0xb0] sm:$0xff] }
 0x109   : > { %967 = vmatpush1.msra.mxu1 %v925_v30  ;;  %v1247_v30 = vld [vmem:[%s5906_s13 + $0xa8] sm:$0xff] }
 0x10a   : > { %968 = vmatprep.subr.mxu1 %v924_v31  ;;  %v1246_v31 = vld [vmem:[%s5906_s13 + $0xa0] sm:$0xff] }
 0x10b   : > { %969 = vmatpush1.msra.mxu1 %v923_v32  ;;  %v1245_v32 = vld [vmem:[%s5906_s13 + $0x98] sm:$0xff] }
 0x10c   : > { %970 = vmatprep.subr.mxu1 %v922_v33  ;;  %v1244_v33 = vld [vmem:[%s5906_s13 + $0x90] sm:$0xff] }
 0x10d   : > { %971 = vmatpush1.msra.mxu1 %v921_v34  ;;  %v1243_v34 = vld [vmem:[%s5906_s13 + $0x88] sm:$0xff] }
 0x10e   : > { %1290 = vmatprep.subr.mxu1 %v1257_v20 }
 0x1be   : > { %v3890_v0 = vpop.f32.mrf.mxu1 }
 0x1c0   : > { %v910_v1 = vpop.f32.mrf.mxu1 }
 0x1c1   : > { %v919_v2 = vmul.f32 %v910_v1, %v4136_v5  ;;  %v1013_v5 = vld [vmem:[%s5940_s1] sm:$0xff]  ;;  %v1277_v1 = vld [vmem:[%s5906_s13 + $0x198] sm:$0xff]  ;;  %s5942_s1 = sld [smem:[#allocation8_spill]] }
 0x1c2   : > { %3578 = vmatpush3.msra.mxu0 %v1013_v5 }
 0x1c3   : > { %v920_v3 = vadd.f32 %v3890_v0, %v919_v2  ;;  %1165 = vmatprep.subr.mxu0 %v1133_v12  ;;  %v1278_v0 = vld [vmem:[%s5906_s13 + $0x1a0] sm:$0xff]  ;;  %v1276_v2 = vld [vmem:[%s5906_s13 + $0x190] sm:$0xff] }
 0x1c5   : > { %3509 = vmatmul.mubr.msk.f32.vlgmr.msra.gmra.mxu1 %vm744_vm0, %v920_v3  ;;  %v1275_v3 = vld [vmem:[%s5906_s13 + $0x188] sm:$0xff] }
 0x1c6   : > { %1291 = vmatpush1.msra.mxu1 %v1256_v21  ;;  %v1271_v21 = vld [vmem:[%s5906_s13 + $0x168] sm:$0xff] }
 0x1c7   : > { %1292 = vmatprep.subr.mxu1 %v1255_v22  ;;  %v1270_v22 = vld [vmem:[%s5906_s13 + $0x160] sm:$0xff] }
 0x1c8   : > { %1293 = vmatpush1.msra.mxu1 %v1254_v23  ;;  %v1269_v23 = vld [vmem:[%s5906_s13 + $0x158] sm:$0xff] }
 0x1c9   : > { %1294 = vmatprep.subr.mxu1 %v1253_v24  ;;  %v1268_v24 = vld [vmem:[%s5906_s13 + $0x150] sm:$0xff] }
 0x1ca   : > { %1295 = vmatpush1.msra.mxu1 %v1252_v25  ;;  %v1267_v25 = vld [vmem:[%s5906_s13 + $0x148] sm:$0xff] }
 0x1cb   : > { %1296 = vmatprep.subr.mxu1 %v1251_v26  ;;  %v1266_v26 = vld [vmem:[%s5906_s13 + $0x140] sm:$0xff] }
 0x1cc   : > { %1297 = vmatpush1.msra.mxu1 %v1250_v27  ;;  %v1265_v27 = vld [vmem:[%s5906_s13 + $0x138] sm:$0xff] }
 0x1cd   : > { %1298 = vmatprep.subr.mxu1 %v1249_v28  ;;  %v1264_v28 = vld [vmem:[%s5906_s13 + $0x130] sm:$0xff] }
 0x1ce   : > { %1299 = vmatpush1.msra.mxu1 %v1248_v29  ;;  %v1263_v29 = vld [vmem:[%s5906_s13 + $0x128] sm:$0xff] }
 0x1cf   : > { %1300 = vmatprep.subr.mxu1 %v1247_v30  ;;  %v1262_v30 = vld [vmem:[%s5906_s13 + $0x120] sm:$0xff] }
 0x1d0   : > { %1301 = vmatpush1.msra.mxu1 %v1246_v31  ;;  %v1261_v31 = vld [vmem:[%s5906_s13 + $0x118] sm:$0xff] }
 0x1d1   : > { %1302 = vmatprep.subr.mxu1 %v1245_v32  ;;  %v1260_v32 = vld [vmem:[%s5906_s13 + $0x110] sm:$0xff] }
 0x1d2   : > { %1303 = vmatpush1.msra.mxu1 %v1244_v33  ;;  %v1259_v33 = vld [vmem:[%s5906_s13 + $0x108] sm:$0xff] }
 0x1d3   : > { %1304 = vmatprep.subr.mxu1 %v1243_v34  ;;  %v1258_v34 = vld [vmem:[%s5906_s13 + $0x100] sm:$0xff] }
 0x1d4   : > { %1305 = vmatpush1.msra.mxu1 %v1242_v36  ;;  %v1394_v36 = vld [vmem:[%s5942_s1 + $0xf8] sm:$0xff] }
 0x1d5   : > { %1306 = vmatprep.subr.mxu1 %v1241_v37  ;;  %v1378_v37 = vld [vmem:[%s5942_s1 + $0x78] sm:$0xff] }
 0x1d6   : > { %1307 = vmatpush1.msra.mxu1 %v1240_v38  ;;  %v1393_v38 = vld [vmem:[%s5942_s1 + $0xf0] sm:$0xff] }
 0x1d7   : > { %1308 = vmatprep.subr.mxu1 %v1239_v39  ;;  %v1377_v39 = vld [vmem:[%s5942_s1 + $0x70] sm:$0xff] }
 0x1d8   : > { %1309 = vmatpush1.msra.mxu1 %v1238_v40  ;;  %v1392_v40 = vld [vmem:[%s5942_s1 + $0xe8] sm:$0xff] }
 0x1d9   : > { %1310 = vmatprep.subr.mxu1 %v1237_v41  ;;  %v1376_v41 = vld [vmem:[%s5942_s1 + $0x68] sm:$0xff] }
 0x1da   : > { %1311 = vmatpush1.msra.mxu1 %v1236_v42  ;;  %v1391_v42 = vld [vmem:[%s5942_s1 + $0xe0] sm:$0xff] }
 0x1db   : > { %1312 = vmatprep.subr.mxu1 %v1235_v43  ;;  %v1375_v43 = vld [vmem:[%s5942_s1 + $0x60] sm:$0xff] }
 0x1dc   : > { %1313 = vmatpush1.msra.mxu1 %v1234_v44  ;;  %v1390_v44 = vld [vmem:[%s5942_s1 + $0xd8] sm:$0xff] }
 0x1dd   : > { %1314 = vmatprep.subr.mxu1 %v1233_v45  ;;  %v1374_v45 = vld [vmem:[%s5942_s1 + $0x58] sm:$0xff] }
 0x1de   : > { %1315 = vmatpush1.msra.mxu1 %v1232_v46  ;;  %v1389_v46 = vld [vmem:[%s5942_s1 + $0xd0] sm:$0xff] }
 0x1df   : > { %1316 = vmatprep.subr.mxu1 %v1231_v47  ;;  %v1373_v47 = vld [vmem:[%s5942_s1 + $0x50] sm:$0xff] }
 0x1e0   : > { %1317 = vmatpush1.msra.mxu1 %v1230_v48  ;;  %v1388_v48 = vld [vmem:[%s5942_s1 + $0xc8] sm:$0xff] }
 0x1e1   : > { %1318 = vmatprep.subr.mxu1 %v1229_v49  ;;  %v1372_v49 = vld [vmem:[%s5942_s1 + $0x48] sm:$0xff] }
 0x1e2   : > { %1319 = vmatpush1.msra.mxu1 %v1228_v50  ;;  %v1387_v50 = vld [vmem:[%s5942_s1 + $0xc0] sm:$0xff] }
 0x1e3   : > { %1320 = vmatprep.subr.mxu1 %v1227_v51  ;;  %v1371_v51 = vld [vmem:[%s5942_s1 + $0x40] sm:$0xff] }
 0x1e4   : > { %1321 = vmatpush1.msra.mxu1 %v1226_v52  ;;  %v1386_v52 = vld [vmem:[%s5942_s1 + $0xb8] sm:$0xff] }
 0x1e5   : > { %1322 = vmatprep.subr.mxu1 %v1289_v53  ;;  %v1370_v53 = vld [vmem:[%s5942_s1 + $0x38] sm:$0xff] }
 0x1e6   : > { %1323 = vmatpush2.msra.mxu1 %v1288_v54  ;;  %v1385_v54 = vld [vmem:[%s5942_s1 + $0xb0] sm:$0xff] }
 0x1e7   : > { %1324 = vmatprep.subr.mxu1 %v1287_v55  ;;  %v1369_v55 = vld [vmem:[%s5942_s1 + $0x30] sm:$0xff] }
 0x1e8   : > { %1325 = vmatpush2.msra.mxu1 %v1286_v56  ;;  %v1384_v56 = vld [vmem:[%s5942_s1 + $0xa8] sm:$0xff] }
 0x1e9   : > { %1326 = vmatprep.subr.mxu1 %v1285_v57  ;;  %v1368_v57 = vld [vmem:[%s5942_s1 + $0x28] sm:$0xff] }
 0x1ea   : > { %1327 = vmatpush2.msra.mxu1 %v1284_v58  ;;  %v1383_v58 = vld [vmem:[%s5942_s1 + $0xa0] sm:$0xff] }
 0x1eb   : > { %1328 = vmatprep.subr.mxu1 %v1283_v59  ;;  %v1367_v59 = vld [vmem:[%s5942_s1 + $0x20] sm:$0xff] }
 0x1ec   : > { %1329 = vmatpush2.msra.mxu1 %v1282_v60  ;;  %v1382_v60 = vld [vmem:[%s5942_s1 + $0x98] sm:$0xff] }
 0x1ed   : > { %1330 = vmatprep.subr.mxu1 %v1281_v61  ;;  %v1366_v61 = vld [vmem:[%s5942_s1 + $0x18] sm:$0xff] }
 0x1ee   : > { %1331 = vmatpush2.msra.mxu1 %v1280_v62  ;;  %v1381_v62 = vld [vmem:[%s5942_s1 + $0x90] sm:$0xff] }
 0x1ef   : > { %1332 = vmatprep.subr.mxu1 %v1279_v63  ;;  %v1365_v63 = vld [vmem:[%s5942_s1 + $0x10] sm:$0xff] }
 0x1f0   : > { %1333 = vmatpush2.msra.mxu1 %v1278_v0 }
 0x1f1   : > { %1334 = vmatprep.subr.mxu1 %v1277_v1 }
 0x1f2   : > { %1335 = vmatpush2.msra.mxu1 %v1276_v2 }
 0x1f3   : > { %1336 = vmatprep.subr.mxu1 %v1275_v3 }
 0x1f4   : > { %1337 = vmatpush2.msra.mxu1 %v1274_v4 }
 0x1f5   : > { %1338 = vmatprep.subr.mxu1 %v1273_v6 }
 0x1f6   : > { %1339 = vmatpush2.msra.mxu1 %v1272_v7 }
 0x1f7   : > { %1340 = vmatprep.subr.mxu1 %v1271_v21  ;;  %v1490_v21 = vld [vmem:[%s5943_s2 + $0x70] sm:$0xff] }
 0x1f8   : > { %1341 = vmatpush2.msra.mxu1 %v1270_v22  ;;  %v1489_v22 = vld [vmem:[%s5943_s2 + $0x68] sm:$0xff] }
 0x1f9   : > { %1342 = vmatprep.subr.mxu1 %v1269_v23  ;;  %v1488_v23 = vld [vmem:[%s5943_s2 + $0x60] sm:$0xff] }
 0x1fa   : > { %1343 = vmatpush2.msra.mxu1 %v1268_v24  ;;  %v1487_v24 = vld [vmem:[%s5943_s2 + $0x58] sm:$0xff] }
 0x1fb   : > { %1344 = vmatprep.subr.mxu1 %v1267_v25  ;;  %v1486_v25 = vld [vmem:[%s5943_s2 + $0x50] sm:$0xff] }
 0x1fc   : > { %1345 = vmatpush2.msra.mxu1 %v1266_v26  ;;  %v1485_v26 = vld [vmem:[%s5943_s2 + $0x48] sm:$0xff] }
 0x1fd   : > { %1346 = vmatprep.subr.mxu1 %v1265_v27  ;;  %v1484_v27 = vld [vmem:[%s5943_s2 + $0x40] sm:$0xff] }
 0x1fe   : > { %1347 = vmatpush2.msra.mxu1 %v1264_v28  ;;  %v1483_v28 = vld [vmem:[%s5943_s2 + $0x38] sm:$0xff] }
 0x1ff   : > { %1348 = vmatprep.subr.mxu1 %v1263_v29  ;;  %v1482_v29 = vld [vmem:[%s5943_s2 + $0x30] sm:$0xff] }
 0x200   : > { %1349 = vmatpush2.msra.mxu1 %v1262_v30  ;;  %v1481_v30 = vld [vmem:[%s5943_s2 + $0x28] sm:$0xff] }
 0x201   : > { %1350 = vmatprep.subr.mxu1 %v1261_v31  ;;  %v1480_v31 = vld [vmem:[%s5943_s2 + $0x20] sm:$0xff] }
 0x202   : > { %1351 = vmatpush2.msra.mxu1 %v1260_v32  ;;  %v1479_v32 = vld [vmem:[%s5943_s2 + $0x18] sm:$0xff] }
 0x203   : > { %1352 = vmatprep.subr.mxu1 %v1259_v33  ;;  %v1478_v33 = vld [vmem:[%s5943_s2 + $0x10] sm:$0xff] }
 0x204   : > { %1353 = vmatpush2.msra.mxu1 %v1258_v34  ;;  %v1477_v34 = vld [vmem:[%s5943_s2 + $0x8] sm:$0xff] }
 0x285   : > { %v4302_v8 = vpop.f32.mrf.mxu1 }
 0x286   : > { %v1011_v11 = vmul.f32 %v4302_v8, %v4302_v8 }
 0x287   : > { %v4304_v9 = vpop.f32.mrf.mxu1 }
 0x288   : > { %v1012_v10 = vmul.f32 %v4304_v9, %v4304_v9  ;;  %1109 = vmatprep.mubr.f32.mxu0 %v4304_v9 }
 0x289   : > { %1110 = vmatmul.mubr.f32.vlgmr.msra.gmra.mxu0 %v4302_v8 }
 0x28a   : > { %1114 = vmatprep.mubr.f32.mxu0 %v1012_v10  ;;  %1166 = vmatpush1.msra.mxu0 %v1132_v13 }
 0x28b   : > { %1167 = vmatprep.subr.mxu0 %v1131_v14 }
 0x28c   : > { %1168 = vmatpush1.msra.mxu0 %v1130_v15 }
 0x28d   : > { %1115 = vmatmul.mubr.f32.gmra.mxu0 %v1011_v11  ;;  %1169 = vmatprep.subr.mxu0 %v1129_v16 }
 0x28e   : > { %1205 = vmatprep.mubr.f32.mxu0 %v3980_v35  ;;  %1170 = vmatpush1.msra.mxu0 %v1128_v17 }
 0x28f   : > { %1171 = vmatprep.subr.mxu0 %v1127_v18 }
 0x290   : > { %1172 = vmatpush1.msra.mxu0 %v1126_v19 }
 0x291   : > { %3585 = vmatprep.subr.mxu0 %v1394_v36  ;;  %v1476_v36 = vld [vmem:[%s5943_s2] sm:$0xff] }
 0x349   : > { %v3579_v5 = vpop.f32.mrf.mxu0 }
 0x34b   : > { %v3580_v10 = vpop.f32.mrf.mxu0 }
 0x34c   : > { %v3581_v11 = vadd.f32 %v3580_v10, %v3579_v5 }
 0x34d   : > { %v3582_v12 = vpop.f32.mrf.mxu0 }
 0x34e   : > { %v1120_v14 = vmul.f32 %v3581_v11, %v3581_v11  ;;  %v1124_v19 = vsub.f32 0.0, %v3581_v11 }
 0x34f   : > { %v3583_v13 = vpop.f32.mrf.mxu0 }
 0x350   : > { %v3584_v15 = vadd.f32 %v3583_v13, %v3582_v12 }
 0x352   : > { %v1121_v16 = vsub.f32 %v3584_v15, %v1120_v14  ;;  %v1380_v14 = vld [vmem:[%s5942_s1 + $0x88] sm:$0xff]  ;;  %v1363_v15 = vld [vmem:[%s5942_s1] sm:$0xff] }
 0x354   : > { %v1122_v17 = vadd.f32 1e-05, %v1121_v16 }
 0x356   : > { %3959 = vrsqrt.f32 %v1122_v17 }
 0x363   : > { %v3960_v18 = vpop.eup %3959 }
 0x364   : > { %3510 = vmatmul.mubr.msk.f32.vlgmr.msra.gmra.mxu0 %vm1134_vm3, %v3960_v18  ;;  %v1125_v20 = vmul.f32 %v3960_v18, %v1124_v19 }
 0x365   : > { %1211 = vmatprep.mubr.f32.mxu0 %v3980_v35  ;;  %3586 = vmatpush3.msra.mxu0 %v1378_v37  ;;  %v1614_v37 = vld [vmem:[%s5907_s14 + $0xf8] sm:$0xff] }
 0x366   : > { %3587 = vmatprep.subr.mxu0 %v1393_v38  ;;  %v1598_v38 = vld [vmem:[%s5907_s14 + $0x78] sm:$0xff]  ;;  %3623 = vmatprep.subr.mxu1 %v1614_v37 }
 0x367   : > { %3588 = vmatpush3.msra.mxu0 %v1377_v39  ;;  %v1613_v39 = vld [vmem:[%s5907_s14 + $0xf0] sm:$0xff] }
 0x368   : > { %3511 = vmatmul.mubr.msk.f32.gmra.mxu0 %vm1134_vm3, %v1125_v20  ;;  %3589 = vmatprep.subr.mxu0 %v1392_v40  ;;  %v1491_v20 = vld [vmem:[%s5943_s2 + $0x78] sm:$0xff]  ;;  %v1597_v40 = vld [vmem:[%s5907_s14 + $0x70] sm:$0xff]  ;;  %s3981_s2 = smov 8  }
 0x369   : > { %3590 = vmatpush3.msra.mxu0 %v1376_v41  ;;  %v1612_v41 = vld [vmem:[%s5907_s14 + $0xe8] sm:$0xff] }
 0x36a   : > { %3591 = vmatprep.subr.mxu0 %v1391_v42  ;;  %v1596_v42 = vld [vmem:[%s5907_s14 + $0x68] sm:$0xff] }
 0x36b   : > { %3592 = vmatpush3.msra.mxu0 %v1375_v43  ;;  %v1611_v43 = vld [vmem:[%s5907_s14 + $0xe0] sm:$0xff] }
 0x36c   : > { %3593 = vmatprep.subr.mxu0 %v1390_v44  ;;  %v1595_v44 = vld [vmem:[%s5907_s14 + $0x60] sm:$0xff] }
 0x36d   : > { %3594 = vmatpush3.msra.mxu0 %v1374_v45  ;;  %v1610_v45 = vld [vmem:[%s5907_s14 + $0xd8] sm:$0xff] }
 0x36e   : > { %3595 = vmatprep.subr.mxu0 %v1389_v46  ;;  %v1594_v46 = vld [vmem:[%s5907_s14 + $0x58] sm:$0xff] }
 0x36f   : > { %3596 = vmatpush3.msra.mxu0 %v1373_v47  ;;  %v1609_v47 = vld [vmem:[%s5907_s14 + $0xd0] sm:$0xff] }
 0x370   : > { %3597 = vmatprep.subr.mxu0 %v1388_v48  ;;  %v1593_v48 = vld [vmem:[%s5907_s14 + $0x50] sm:$0xff] }
 0x371   : > { %3598 = vmatpush3.msra.mxu0 %v1372_v49  ;;  %v1608_v49 = vld [vmem:[%s5907_s14 + $0xc8] sm:$0xff] }
 0x372   : > { %3599 = vmatprep.subr.mxu0 %v1387_v50  ;;  %v1592_v50 = vld [vmem:[%s5907_s14 + $0x48] sm:$0xff] }
 0x373   : > { %3600 = vmatpush3.msra.mxu0 %v1371_v51  ;;  %v1607_v51 = vld [vmem:[%s5907_s14 + $0xc0] sm:$0xff] }
 0x374   : > { %3601 = vmatprep.subr.mxu0 %v1386_v52  ;;  %v1591_v52 = vld [vmem:[%s5907_s14 + $0x40] sm:$0xff] }
 0x375   : > { %3602 = vmatpush3.msra.mxu0 %v1370_v53  ;;  %v1606_v53 = vld [vmem:[%s5907_s14 + $0xb8] sm:$0xff] }
 0x376   : > { %3603 = vmatprep.subr.mxu0 %v1385_v54  ;;  %v1590_v54 = vld [vmem:[%s5907_s14 + $0x38] sm:$0xff] }
 0x377   : > { %3604 = vmatpush3.msra.mxu0 %v1369_v55 }
 0x378   : > { %3605 = vmatprep.subr.mxu0 %v1384_v56 }
 0x379   : > { %3606 = vmatpush3.msra.mxu0 %v1368_v57 }
 0x37a   : > { %3607 = vmatprep.subr.mxu0 %v1383_v58 }
 0x37b   : > { %3608 = vmatpush3.msra.mxu0 %v1367_v59 }
 0x37c   : > { %3609 = vmatprep.subr.mxu0 %v1382_v60 }
 0x37d   : > { %3610 = vmatpush3.msra.mxu0 %v1366_v61 }
 0x37e   : > { %3611 = vmatprep.subr.mxu0 %v1381_v62 }
 0x37f   : > { %3612 = vmatpush3.msra.mxu0 %v1365_v63 }
 0x380   : > { %3613 = vmatprep.subr.mxu0 %v1380_v14  ;;  %v1585_v14 = vld [vmem:[%s5907_s14 + $0x10] sm:$0xff] }
 0x424   : > { %v1207_v0 = vpop.f32.mrf.mxu0 }
 0x425   : > { %v1218_v2 = vmul.f32 %v1207_v0, %v4302_v8  ;;  %v1364_v8 = vld [vmem:[%s5942_s1 + $0x8] sm:$0xff] }
 0x426   : > { %v1209_v1 = vpop.f32.mrf.mxu0  ;;  %3614 = vmatpush3.msra.mxu0 %v1364_v8  ;;  %v1600_v8 = vld [vmem:[%s5907_s14 + $0x88] sm:$0xff] }
 0x427   : > { %v1219_v4 = vmul.f32 %v1209_v1, %v4304_v9  ;;  %v1379_v9 = vld [vmem:[%s5942_s1 + $0x80] sm:$0xff]  ;;  %s5944_s1 = sld [smem:[#allocation3_spill]] }
 0x428   : > { %v1213_v3 = vpop.f32.mrf.mxu0  ;;  %3615 = vmatprep.subr.mxu0 %v1379_v9  ;;  %v1584_v9 = vld [vmem:[%s5907_s14 + $0x8] sm:$0xff] }
 0x429   : > { %v1220_v6 = vadd.f32 %v1218_v2, %v1213_v3  ;;  %3616 = vmatpush3.msra.mxu0 %v1363_v15  ;;  %v1605_v3 = vld [vmem:[%s5907_s14 + $0xb0] sm:$0xff]  ;;  %v1599_v15 = vld [vmem:[%s5907_s14 + $0x80] sm:$0xff] }
 0x42a   : > { %v1215_v7 = vpop.f32.mrf.mxu0  ;;  %1514 = vmatprep.subr.mxu0 %v1491_v20 }
 0x42b   : > { %v1221_v5 = vadd.f32 %v1219_v4, %v1215_v7  ;;  %v1222_v10 = vmul.f32 0.01, %v1220_v6  ;;  %v1589_v4 = vld [vmem:[%s5907_s14 + $0x30] sm:$0xff]  ;;  %v1588_v7 = vld [vmem:[%s5907_s14 + $0x28] sm:$0xff] }
 0x42d   : > { %v1223_v11 = vmul.f32 0.01, %v1221_v5  ;;  %v1224_v13 = vmax.f32 %v1220_v6, %v1222_v10  ;;  %v1604_v6 = vld [vmem:[%s5907_s14 + $0xa8] sm:$0xff]  ;;  %v1587_v10 = vld [vmem:[%s5907_s14 + $0x20] sm:$0xff]  ;;  %s725_s25 = scalar_lea.vmem %s5944_s1, %s4124_s28  ;;  %s4809_s1 = scalar_lea.vmem %s5916_s23, %s4124_s28 }
 0x42f   : > { %v1225_v12 = vmax.f32 %v1221_v5, %v1223_v11  ;;  %v1603_v5 = vld [vmem:[%s5907_s14 + $0xa0] sm:$0xff]  ;;  %v1602_v11 = vld [vmem:[%s5907_s14 + $0x98] sm:$0xff] }
 0x431   : > { %1354 = vmatprep.mubr.f32.mxu1 %v1225_v12  ;;  %v1586_v12 = vld [vmem:[%s5907_s14 + $0x18] sm:$0xff] }
 0x432   : > { %1355 = vmatmul.mubr.f32.vlgmr.msra.gmra.mxu1 %v1224_v13  ;;  %v1601_v13 = vld [vmem:[%s5907_s14 + $0x90] sm:$0xff] }
 0x433   : > { %3624 = vmatpush3.msra.mxu1 %v1598_v38 }
 0x434   : > { %3625 = vmatprep.subr.mxu1 %v1613_v39 }
 0x435   : > { %3626 = vmatpush3.msra.mxu1 %v1597_v40 }
 0x436   : > { %3627 = vmatprep.subr.mxu1 %v1612_v41 }
 0x437   : > { %3628 = vmatpush3.msra.mxu1 %v1596_v42 }
 0x438   : > { %3629 = vmatprep.subr.mxu1 %v1611_v43 }
 0x439   : > { %3630 = vmatpush3.msra.mxu1 %v1595_v44 }
 0x43a   : > { %3631 = vmatprep.subr.mxu1 %v1610_v45 }
 0x43b   : > { %3632 = vmatpush3.msra.mxu1 %v1594_v46  ;;  %v1843_v46 = vld [vmem:[%s5911_s18 + $0x170] sm:$0xff] }
 0x43c   : > { %3633 = vmatprep.subr.mxu1 %v1609_v47  ;;  %v1842_v47 = vld [vmem:[%s5911_s18 + $0x168] sm:$0xff] }
 0x43d   : > { %3634 = vmatpush3.msra.mxu1 %v1593_v48 }
 0x43e   : > { %3635 = vmatprep.subr.mxu1 %v1608_v49  ;;  %v1840_v49 = vld [vmem:[%s5911_s18 + $0x158] sm:$0xff] }
 0x43f   : > { %3636 = vmatpush3.msra.mxu1 %v1592_v50  ;;  %v1839_v50 = vld [vmem:[%s5911_s18 + $0x150] sm:$0xff] }
 0x440   : > { %3637 = vmatprep.subr.mxu1 %v1607_v51  ;;  %v1837_v51 = vld [vmem:[%s5911_s18 + $0x140] sm:$0xff] }
 0x441   : > { %3638 = vmatpush3.msra.mxu1 %v1591_v52 }
 0x442   : > { %3639 = vmatprep.subr.mxu1 %v1606_v53  ;;  %v1836_v53 = vld [vmem:[%s5911_s18 + $0x138] sm:$0xff] }
 0x443   : > { %3640 = vmatpush3.msra.mxu1 %v1590_v54 }
 0x444   : > { %3641 = vmatprep.subr.mxu1 %v1605_v3  ;;  %v1825_v3 = vld [vmem:[%s5911_s18 + $0xe0] sm:$0xff] }
 0x445   : > { %3642 = vmatpush3.msra.mxu1 %v1589_v4  ;;  %v1841_v4 = vld [vmem:[%s5911_s18 + $0x160] sm:$0xff] }
 0x446   : > { %3643 = vmatprep.subr.mxu1 %v1604_v6  ;;  %v1824_v6 = vld [vmem:[%s5911_s18 + $0xd8] sm:$0xff] }
 0x447   : > { %3644 = vmatpush3.msra.mxu1 %v1588_v7  ;;  %v1886_v7 = vld [vmem:[%s5911_s18 + $0x2c8] sm:$0xff] }
 0x448   : > { %3645 = vmatprep.subr.mxu1 %v1603_v5  ;;  %v1822_v5 = vld [vmem:[%s5911_s18 + $0xc8] sm:$0xff] }
 0x449   : > { %3646 = vmatpush3.msra.mxu1 %v1587_v10  ;;  %v1838_v10 = vld [vmem:[%s5911_s18 + $0x148] sm:$0xff] }
 0x44a   : > { %3647 = vmatprep.subr.mxu1 %v1602_v11  ;;  %v1821_v11 = vld [vmem:[%s5911_s18 + $0xc0] sm:$0xff] }
 0x44b   : > { %3648 = vmatpush3.msra.mxu1 %v1586_v12  ;;  %v1883_v12 = vld [vmem:[%s5911_s18 + $0x2b0] sm:$0xff] }
 0x44c   : > { %3649 = vmatprep.subr.mxu1 %v1601_v13  ;;  %v1819_v13 = vld [vmem:[%s5911_s18 + $0xb0] sm:$0xff] }
 0x44d   : > { %3650 = vmatpush3.msra.mxu1 %v1585_v14  ;;  %v1835_v14 = vld [vmem:[%s5911_s18 + $0x130] sm:$0xff] }
 0x44e   : > { %3651 = vmatprep.subr.mxu1 %v1600_v8  ;;  %v1818_v8 = vld [vmem:[%s5911_s18 + $0xa8] sm:$0xff] }
 0x44f   : > { %3652 = vmatpush3.msra.mxu1 %v1584_v9  ;;  %v1880_v9 = vld [vmem:[%s5911_s18 + $0x298] sm:$0xff] }
 0x450   : > { %3653 = vmatprep.subr.mxu1 %v1599_v15  ;;  %v1816_v15 = vld [vmem:[%s5911_s18 + $0x98] sm:$0xff] }
 0x4f2   : > { %v4630_v16 = vpop.f32.mrf.mxu1 }
 0x4f3   : > { %v1361_v19 = vmul.f32 %v4630_v16, %v4630_v16 }
 0x4f4   : > { %v4632_v17 = vpop.f32.mrf.mxu1 }
 0x4f5   : > { %v1362_v18 = vmul.f32 %v4632_v17, %v4632_v17  ;;  %1459 = vmatprep.mubr.f32.mxu0 %v4632_v17 }
 0x4f6   : > { %1460 = vmatmul.mubr.f32.vlgmr.msra.gmra.mxu0 %v4630_v16 }
 0x4f7   : > { %1464 = vmatprep.mubr.f32.mxu0 %v1362_v18  ;;  %1515 = vmatpush1.msra.mxu0 %v1490_v21  ;;  %v1583_v18 = vld [vmem:[%s5907_s14] sm:$0xff] }
 0x4f8   : > { %1516 = vmatprep.subr.mxu0 %v1489_v22  ;;  %3654 = vmatpush3.msra.mxu1 %v1583_v18  ;;  %v1832_v18 = vld [vmem:[%s5911_s18 + $0x118] sm:$0xff] }
 0x4f9   : > { %1517 = vmatpush1.msra.mxu0 %v1488_v23 }
 0x4fa   : > { %1465 = vmatmul.mubr.f32.gmra.mxu0 %v1361_v19  ;;  %1518 = vmatprep.subr.mxu0 %v1487_v24  ;;  %v1695_v19 = vld [vmem:[%s725_s25] sm:$0xff]  ;;  %s5926_s25 = smov 120  }
 0x4fb   : > { %1562 = vmatprep.mubr.f32.mxu0 %v3980_v35  ;;  %1519 = vmatpush1.msra.mxu0 %v1486_v25 }
 0x4fc   : > { %1520 = vmatprep.subr.mxu0 %v1485_v26  ;;  %1697 = vrot.lane.b32.xlu0 %v1695_v19, %s3981_s2  ;;  %v1815_v19 = vld [vmem:[%s5911_s18 + $0x90] sm:$0xff] }
 0x4fd   : > { %1521 = vmatpush1.msra.mxu0 %v1484_v27 }
 0x4fe   : > { %1522 = vmatprep.subr.mxu0 %v1483_v28 }
 0x4ff   : > { %1523 = vmatpush1.msra.mxu0 %v1482_v29 }
 0x500   : > { %1524 = vmatprep.subr.mxu0 %v1481_v30 }
 0x501   : > { %1525 = vmatpush1.msra.mxu0 %v1480_v31 }
 0x502   : > { %1526 = vmatprep.subr.mxu0 %v1479_v32 }
 0x503   : > { %1527 = vmatpush1.msra.mxu0 %v1478_v33  ;;  %v1707_v33 = vld [vmem:[%s5909_s16 + $0x8] sm:$0xff] }
 0x504   : > { %1528 = vmatprep.subr.mxu0 %v1477_v34 }
 0x505   : > { %1529 = vmatpush1.msra.mxu0 %v1476_v36 }
 0x506   : > { %1756 = vmatprep.subr.mxu0 %v1707_v33  ;;  %v1804_v33 = vld [vmem:[%s5911_s18 + $0x38] sm:$0xff] }
 0x56e   : > { %v1698_v41 = vpop.permute.xlu0 %1697 }
 0x5b6   : > { %v3617_v55 = vpop.f32.mrf.mxu0 }
 0x5b8   : > { %v3618_v56 = vpop.f32.mrf.mxu0 }
 0x5b9   : > { %v3619_v57 = vadd.f32 %v3618_v56, %v3617_v55  ;;  %v1834_v55 = vld [vmem:[%s5911_s18 + $0x128] sm:$0xff] }
 0x5ba   : > { %v3620_v58 = vpop.f32.mrf.mxu0 }
 0x5bb   : > { %v1470_v60 = vmul.f32 %v3619_v57, %v3619_v57  ;;  %v1474_v1 = vsub.f32 0.0, %v3619_v57 }
 0x5bc   : > { %v3621_v59 = vpop.f32.mrf.mxu0 }
 0x5bd   : > { %v3622_v61 = vadd.f32 %v3621_v59, %v3620_v58  ;;  %v1833_v58 = vld [vmem:[%s5911_s18 + $0x120] sm:$0xff]  ;;  %v1831_v59 = vld [vmem:[%s5911_s18 + $0x110] sm:$0xff] }
 0x5bf   : > { %v1471_v62 = vsub.f32 %v3622_v61, %v1470_v60  ;;  %v1830_v61 = vld [vmem:[%s5911_s18 + $0x108] sm:$0xff] }
 0x5c1   : > { %v1472_v63 = vadd.f32 1e-05, %v1471_v62  ;;  %v1828_v62 = vld [vmem:[%s5911_s18 + $0xf8] sm:$0xff] }
 0x5c3   : > { %3961 = vrsqrt.f32 %v1472_v63  ;;  %v1892_v63 = vld [vmem:[%s5911_s18 + $0x2f8] sm:$0xff] }
 0x5c4   : > { %3658 = vmatprep.subr.mxu1 %v1892_v63  ;;  %v1867_v63 = vld [vmem:[%s5911_s18 + $0x230] sm:$0xff] }
 0x5d0   : > { %v3962_v0 = vpop.eup %3961 }
 0x5d1   : > { %3512 = vmatmul.mubr.msk.f32.vlgmr.msra.gmra.mxu0 %vm744_vm0, %v3962_v0  ;;  %v1475_v2 = vmul.f32 %v3962_v0, %v1474_v1  ;;  %v1844_v0 = vld [vmem:[%s5911_s18 + $0x178] sm:$0xff]  ;;  %v1827_v1 = vld [vmem:[%s5911_s18 + $0xf0] sm:$0xff] }
 0x5d2   : > { %1568 = vmatprep.mubr.f32.mxu0 %v3980_v35 }
 0x5d5   : > { %3513 = vmatmul.mubr.msk.f32.gmra.mxu0 %vm744_vm0, %v1475_v2  ;;  %v1889_v2 = vld [vmem:[%s5911_s18 + $0x2e0] sm:$0xff] }
 0x5d6   : > { %1790 = vmatprep.mubr.f32.mxu0 %v3980_v35 }
 0x691   : > { %v1564_v20 = vpop.f32.mrf.mxu0 }
 0x692   : > { %v1575_v22 = vmul.f32 %v1564_v20, %v4630_v16  ;;  %v1706_v16 = vld [vmem:[%s5909_s16] sm:$0xff] }
 0x693   : > { %v1566_v21 = vpop.f32.mrf.mxu0  ;;  %1757 = vmatpush1.msra.mxu0 %v1706_v16  ;;  %v1877_v20 = vld [vmem:[%s5911_s18 + $0x280] sm:$0xff]  ;;  %v1820_v16 = vld [vmem:[%s5911_s18 + $0xb8] sm:$0xff] }
 0x694   : > { %v1576_v24 = vmul.f32 %v1566_v21, %v4632_v17  ;;  %v3514_v17 = vld [vmem:[%s5908_s15] ss:$0 sm:$0xff]  ;;  %1893 = vmatprep.subr.mxu0 %v1843_v46  ;;  %v1890_v46 = vld [vmem:[%s5911_s18 + $0x2e8] sm:$0xff] }
 0x695   : > { %v1570_v23 = vpop.f32.mrf.mxu0  ;;  %v1813_v21 = vld [vmem:[%s5911_s18 + $0x80] sm:$0xff] }
 0x696   : > { %v1577_v25 = vadd.f32 %v1575_v22, %v1570_v23  ;;  %v1829_v22 = vld [vmem:[%s5911_s18 + $0x100] sm:$0xff]  ;;  %v1812_v23 = vld [vmem:[%s5911_s18 + $0x78] sm:$0xff] }
 0x697   : > { %v1572_v26 = vpop.f32.mrf.mxu0 }
 0x698   : > { %v1578_v27 = vadd.f32 %v1576_v24, %v1572_v26  ;;  %v1579_v28 = vmul.f32 0.01, %v1577_v25  ;;  %v1874_v24 = vld [vmem:[%s5911_s18 + $0x268] sm:$0xff] }
 0x699   : > { %v1826_v26 = vld [vmem:[%s5911_s18 + $0xe8] sm:$0xff] }
 0x69a   : > { %v1580_v29 = vmul.f32 0.01, %v1578_v27  ;;  %v1581_v31 = vmax.f32 %v1577_v25, %v1579_v28  ;;  %v1810_v25 = vld [vmem:[%s5911_s18 + $0x68] sm:$0xff]  ;;  %v1871_v28 = vld [vmem:[%s5911_s18 + $0x250] sm:$0xff] }
 0x69c   : > { %v1582_v30 = vmax.f32 %v1578_v27, %v1580_v29  ;;  %v1809_v27 = vld [vmem:[%s5911_s18 + $0x60] sm:$0xff]  ;;  %v1807_v29 = vld [vmem:[%s5911_s18 + $0x50] sm:$0xff] }
 0x69e   : > { %1686 = vmatprep.mubr.f32.mxu1 %v1582_v30  ;;  %v1823_v30 = vld [vmem:[%s5911_s18 + $0xd0] sm:$0xff] }
 0x69f   : > { %1687 = vmatmul.mubr.f32.vlgmr.msra.gmra.mxu1 %v1581_v31  ;;  %v1806_v31 = vld [vmem:[%s5911_s18 + $0x48] sm:$0xff] }
 0x6a0   : > { %3659 = vmatpush3.msra.mxu1 %v1844_v0  ;;  %v1866_v0 = vld [vmem:[%s5911_s18 + $0x228] sm:$0xff] }
 0x6a1   : > { %3660 = vmatprep.subr.mxu1 %v1889_v2  ;;  %v1863_v2 = vld [vmem:[%s5911_s18 + $0x210] sm:$0xff] }
 0x6a2   : > { %3661 = vmatpush3.msra.mxu1 %v1841_v4  ;;  %v1860_v4 = vld [vmem:[%s5911_s18 + $0x1f8] sm:$0xff] }
 0x6a3   : > { %3662 = vmatprep.subr.mxu1 %v1886_v7  ;;  %v1857_v7 = vld [vmem:[%s5911_s18 + $0x1e0] sm:$0xff] }
 0x6a4   : > { %3663 = vmatpush3.msra.mxu1 %v1838_v10  ;;  %v1854_v10 = vld [vmem:[%s5911_s18 + $0x1c8] sm:$0xff] }
 0x6a5   : > { %3664 = vmatprep.subr.mxu1 %v1883_v12  ;;  %v1853_v12 = vld [vmem:[%s5911_s18 + $0x1c0] sm:$0xff] }
 0x6a6   : > { %3665 = vmatpush3.msra.mxu1 %v1835_v14  ;;  %v1805_v14 = vld [vmem:[%s5911_s18 + $0x40] sm:$0xff] }
 0x6a7   : > { %3666 = vmatprep.subr.mxu1 %v1880_v9  ;;  %v1850_v9 = vld [vmem:[%s5911_s18 + $0x1a8] sm:$0xff] }
 0x6a8   : > { %3667 = vmatpush3.msra.mxu1 %v1832_v18  ;;  %v1802_v18 = vld [vmem:[%s5911_s18 + $0x28] sm:$0xff] }
 0x6a9   : > { %3668 = vmatprep.subr.mxu1 %v1877_v20  ;;  %v1847_v20 = vld [vmem:[%s5911_s18 + $0x190] sm:$0xff] }
 0x6aa   : > { %3669 = vmatpush3.msra.mxu1 %v1829_v22  ;;  %v1799_v22 = vld [vmem:[%s5911_s18 + $0x10] sm:$0xff] }
 0x6ab   : > { %3670 = vmatprep.subr.mxu1 %v1874_v24 }
 0x6ac   : > { %3671 = vmatpush3.msra.mxu1 %v1826_v26  ;;  %v2072_v26 = vld [vmem:[%s5901_s8 + $0x118] sm:$0xff] }
 0x6ad   : > { %3672 = vmatprep.subr.mxu1 %v1871_v28 }
 0x6ae   : > { %3673 = vmatpush3.msra.mxu1 %v1823_v30 }
 0x75f   : > { %v3655_v32 = vpop.f32.mrf.mxu1 }
 0x761   : > { %v3656_v34 = vpop.f32.mrf.mxu1 }
 0x762   : > { %v3657_v36 = vadd.f32 %v3656_v34, %v3655_v32  ;;  %v1868_v32 = vld [vmem:[%s5911_s18 + $0x238] sm:$0xff]  ;;  %v1865_v34 = vld [vmem:[%s5911_s18 + $0x220] sm:$0xff] }
 0x763   : > { %3674 = vmatprep.subr.mxu1 %v1868_v32 }
 0x764   : > { %v1689_v37 = vadd.f32 %v3657_v36, %v3514_v17  ;;  %v1803_v17 = vld [vmem:[%s5911_s18 + $0x30] sm:$0xff]  ;;  %v1801_v36 = vld [vmem:[%s5911_s18 + $0x20] sm:$0xff]  ;;  %3675 = vmatpush3.msra.mxu1 %v1820_v16 }
 0x765   : > { %3676 = vmatprep.subr.mxu1 %v1865_v34 }
 0x766   : > { %1702 = vrot.lane.b32.xlu0 %v1689_v37, %s3981_s2  ;;  %3394 = vst.msk [vmem:[%s4809_s1] sm:$0xff] %vm2847_vm4, %v1689_v37  ;;  %v1692_v38 = vmul.f32 0.5, %v1689_v37  ;;  %v3378_v45 = vmul.f32 %v1689_v37, %v1689_v37  ;;  %v3377_v52 = vadd.f32 1.0, %v1689_v37  ;;  %v1817_v37 = vld [vmem:[%s5911_s18 + $0xa0] sm:$0xff] }
 0x767   : > { %3677 = vmatpush3.msra.mxu1 %v1817_v37  ;;  %v2052_v37 = vld [vmem:[%s5901_s8 + $0x78] sm:$0xff] }
 0x768   : > { %v1693_v39 = vmul.f32 1.442695, %v1692_v38  ;;  %v1800_v38 = vld [vmem:[%s5911_s18 + $0x18] sm:$0xff] }
 0x76a   : > { %3963 = vpow2.f32 %v1693_v39  ;;  %v1862_v39 = vld [vmem:[%s5911_s18 + $0x208] sm:$0xff] }
 0x76b   : > { %3678 = vmatprep.subr.mxu1 %v1862_v39  ;;  %v2051_v39 = vld [vmem:[%s5901_s8 + $0x70] sm:$0xff] }
 0x777   : > { %v3964_v40 = vpop.eup %3963 }
 0x778   : > { %v1700_v42 = vmul.f32 %v3964_v40, %v1698_v41  ;;  %v3384_v56 = vmul.f32 %v3964_v40, %v3964_v40  ;;  %v1798_v40 = vld [vmem:[%s5911_s18 + $0x8] sm:$0xff] }
 0x779   : > { %v1814_v41 = vld [vmem:[%s5911_s18 + $0x88] sm:$0xff] }
 0x77a   : > { %3679 = vmatpush3.msra.mxu1 %v1814_v41  ;;  %v2050_v41 = vld [vmem:[%s5901_s8 + $0x68] sm:$0xff] }
 0x7d8   : > { %v1703_v43 = vpop.permute.xlu0 %1702 }
 0x7d9   : > { %v1705_v44 = vadd.f32 %v1703_v43, %v1700_v42  ;;  %v1797_v42 = vld [vmem:[%s5911_s18] sm:$0xff]  ;;  %v1859_v43 = vld [vmem:[%s5911_s18 + $0x1f0] sm:$0xff] }
 0x7da   : > { %3680 = vmatprep.subr.mxu1 %v1859_v43  ;;  %v2049_v43 = vld [vmem:[%s5901_s8 + $0x60] sm:$0xff] }
 0x7db   : > { %1721 = vrot.lane.b32.xlu1 %v1705_v44, %s5926_s25  ;;  %v1891_v44 = vld [vmem:[%s5911_s18 + $0x2f0] sm:$0xff] }
 0x7df   : > { %3380 = vrot.lane.b32.xlu1 %v3378_v45, %s3981_s2  ;;  %v1811_v45 = vld [vmem:[%s5911_s18 + $0x70] sm:$0xff] }
 0x7e0   : > { %3681 = vmatpush3.msra.mxu1 %v1811_v45  ;;  %v2048_v45 = vld [vmem:[%s5901_s8 + $0x58] sm:$0xff] }
 0x84d   : > { %v1722_v48 = vpop.permute.xlu1 %1721 }
 0x84e   : > { %3515 = vmatmul.mubr.msk.f32.vlgmr.msra.gmra.mxu0 %vm1723_vm5, %v1722_v48  ;;  %v1888_v48 = vld [vmem:[%s5911_s18 + $0x2d8] sm:$0xff] }
 0x84f   : > { %1894 = vmatpush1.msra.mxu0 %v1842_v47  ;;  %v1856_v47 = vld [vmem:[%s5911_s18 + $0x1d8] sm:$0xff] }
 0x850   : > { %1895 = vmatprep.subr.mxu0 %v1840_v49  ;;  %v1808_v49 = vld [vmem:[%s5911_s18 + $0x58] sm:$0xff]  ;;  %3682 = vmatprep.subr.mxu1 %v1856_v47  ;;  %v2047_v47 = vld [vmem:[%s5901_s8 + $0x50] sm:$0xff] }
 0x851   : > { %v3381_v54 = vpop.permute.xlu1 %3380  ;;  %1896 = vmatpush1.msra.mxu0 %v1839_v50  ;;  %v1887_v50 = vld [vmem:[%s5911_s18 + $0x2d0] sm:$0xff]  ;;  %3683 = vmatpush3.msra.mxu1 %v1808_v49  ;;  %v2046_v49 = vld [vmem:[%s5901_s8 + $0x48] sm:$0xff] }
 0x852   : > { %v3383_v57 = vsub.f32 %v3377_v52, %v3381_v54  ;;  %1897 = vmatprep.subr.mxu0 %v1837_v51  ;;  %v1885_v51 = vld [vmem:[%s5911_s18 + $0x2c0] sm:$0xff]  ;;  %v1884_v52 = vld [vmem:[%s5911_s18 + $0x2b8] sm:$0xff]  ;;  %3684 = vmatprep.subr.mxu1 %v1853_v12 }
 0x853   : > { %1898 = vmatpush1.msra.mxu0 %v1836_v53  ;;  %v1882_v53 = vld [vmem:[%s5911_s18 + $0x2a8] sm:$0xff]  ;;  %v1881_v54 = vld [vmem:[%s5911_s18 + $0x2a0] sm:$0xff]  ;;  %3685 = vmatpush3.msra.mxu1 %v1805_v14 }
 0x854   : > { %v3385_v60 = vsub.f32 %v3383_v57, %v3384_v56  ;;  %1899 = vmatprep.subr.mxu0 %v1834_v55  ;;  %v1879_v55 = vld [vmem:[%s5911_s18 + $0x290] sm:$0xff]  ;;  %v1878_v56 = vld [vmem:[%s5911_s18 + $0x288] sm:$0xff]  ;;  %v1876_v57 = vld [vmem:[%s5911_s18 + $0x278] sm:$0xff]  ;;  %3686 = vmatprep.subr.mxu1 %v1850_v9 }
 0x855   : > { %1900 = vmatpush1.msra.mxu0 %v1833_v58  ;;  %v1875_v58 = vld [vmem:[%s5911_s18 + $0x270] sm:$0xff]  ;;  %3687 = vmatpush3.msra.mxu1 %v1802_v18  ;;  %v2244_v18 = vld [vmem:[%s5902_s9 + $0x48] sm:$0xff] }
 0x856   : > { %3387 = vrot.lane.b32.xlu0 %v3385_v60, %s5945_s5  ;;  %1901 = vmatprep.subr.mxu0 %v1831_v59  ;;  %v1873_v59 = vld [vmem:[%s5911_s18 + $0x260] sm:$0xff]  ;;  %v1872_v60 = vld [vmem:[%s5911_s18 + $0x258] sm:$0xff] }
 0x857   : > { %1902 = vmatpush1.msra.mxu0 %v1830_v61  ;;  %v1870_v61 = vld [vmem:[%s5911_s18 + $0x248] sm:$0xff]  ;;  %3688 = vmatprep.subr.mxu1 %v1847_v20  ;;  %v2241_v20 = vld [vmem:[%s5902_s9 + $0x30] sm:$0xff] }
 0x858   : > { %1903 = vmatprep.subr.mxu0 %v1828_v62  ;;  %v1869_v62 = vld [vmem:[%s5911_s18 + $0x240] sm:$0xff]  ;;  %3689 = vmatpush3.msra.mxu1 %v1799_v22  ;;  %v2238_v22 = vld [vmem:[%s5902_s9 + $0x18] sm:$0xff] }
 0x859   : > { %1904 = vmatpush1.msra.mxu0 %v1827_v1  ;;  %v1864_v1 = vld [vmem:[%s5911_s18 + $0x218] sm:$0xff] }
 0x85a   : > { %1905 = vmatprep.subr.mxu0 %v1825_v3  ;;  %v1861_v3 = vld [vmem:[%s5911_s18 + $0x200] sm:$0xff] }
 0x85b   : > { %1906 = vmatpush1.msra.mxu0 %v1824_v6  ;;  %v1858_v6 = vld [vmem:[%s5911_s18 + $0x1e8] sm:$0xff] }
 0x85c   : > { %1907 = vmatprep.subr.mxu0 %v1822_v5  ;;  %v1855_v5 = vld [vmem:[%s5911_s18 + $0x1d0] sm:$0xff] }
 0x85d   : > { %1908 = vmatpush1.msra.mxu0 %v1821_v11  ;;  %v1852_v11 = vld [vmem:[%s5911_s18 + $0x1b8] sm:$0xff] }
 0x85e   : > { %1909 = vmatprep.subr.mxu0 %v1819_v13  ;;  %v1851_v13 = vld [vmem:[%s5911_s18 + $0x1b0] sm:$0xff] }
 0x85f   : > { %1910 = vmatpush1.msra.mxu0 %v1818_v8  ;;  %v1849_v8 = vld [vmem:[%s5911_s18 + $0x1a0] sm:$0xff] }
 0x860   : > { %1911 = vmatprep.subr.mxu0 %v1816_v15  ;;  %v1848_v15 = vld [vmem:[%s5911_s18 + $0x198] sm:$0xff] }
 0x861   : > { %1912 = vmatpush1.msra.mxu0 %v1815_v19  ;;  %v1846_v19 = vld [vmem:[%s5911_s18 + $0x188] sm:$0xff] }
 0x862   : > { %1913 = vmatprep.subr.mxu0 %v1813_v21  ;;  %v1845_v21 = vld [vmem:[%s5911_s18 + $0x180] sm:$0xff] }
 0x863   : > { %1914 = vmatpush1.msra.mxu0 %v1812_v23 }
 0x864   : > { %1915 = vmatprep.subr.mxu0 %v1810_v25  ;;  %v2068_v25 = vld [vmem:[%s5901_s8 + $0xf8] sm:$0xff] }
 0x865   : > { %1916 = vmatpush1.msra.mxu0 %v1809_v27  ;;  %3693 = vmatprep.subr.mxu1 %v2068_v25  ;;  %v1710_v27 = vlaneseq  ;;  %v5263_v25 = vld [vmem:[%s5902_s9 + $0x58] sm:$0xff] }
 0x866   : > { %1917 = vmatprep.subr.mxu0 %v1807_v29 }
 0x867   : > { %1918 = vmatpush1.msra.mxu0 %v1806_v31  ;;  %v1711_v28 = vshrl.u32 %v1710_v27, 7  ;;  %v1708_v31 = vld [vmem:[%s5910_s17] sm:$0x3]  ;;  %v2462_v27 = vld [vmem:[%s5912_s19 + $0x168] sm:$0xff] }
 0x868   : > { %1919 = vmatprep.subr.mxu0 %v1804_v33 }
 0x869   : > { %1920 = vmatpush1.msra.mxu0 %v1803_v17  ;;  %v1716_v29 = vsub.s32 1, %v1711_v28  ;;  %v1712_v30 = vsub.s32 0, %v1711_v28  ;;  %v2460_v28 = vld [vmem:[%s5912_s19 + $0x158] sm:$0xff] }
 0x86a   : > { %1921 = vmatprep.subr.mxu0 %v1801_v36 }
 0x86b   : > { %1922 = vmatpush1.msra.mxu0 %v1800_v38  ;;  %v1717_v32 = vrot.slane %v1708_v31, %v1716_v29  ;;  %v1713_v33 = vrot.slane %v1708_v31, %v1712_v30  ;;  %v2067_v38 = vld [vmem:[%s5901_s8 + $0xf0] sm:$0xff]  ;;  %v2457_v30 = vld [vmem:[%s5912_s19 + $0x140] sm:$0xff]  ;;  %v2456_v31 = vld [vmem:[%s5912_s19 + $0x138] sm:$0xff] }
 0x86c   : > { %1923 = vmatprep.subr.mxu0 %v1798_v40  ;;  %v2066_v40 = vld [vmem:[%s5901_s8 + $0xe8] sm:$0xff]  ;;  %v2459_v29 = vld [vmem:[%s5912_s19 + $0x150] sm:$0xff] }
 0x86d   : > { %1924 = vmatpush1.msra.mxu0 %v1797_v42  ;;  %v2065_v42 = vld [vmem:[%s5901_s8 + $0xe0] sm:$0xff] }
 0x86e   : > { %1925 = vmatprep.subr.mxu0 %v1891_v44  ;;  %v2064_v44 = vld [vmem:[%s5901_s8 + $0xd8] sm:$0xff] }
 0x86f   : > { %1926 = vmatpush2.msra.mxu0 %v1890_v46  ;;  %v2063_v46 = vld [vmem:[%s5901_s8 + $0xd0] sm:$0xff] }
 0x870   : > { %1927 = vmatprep.subr.mxu0 %v1888_v48  ;;  %v2062_v48 = vld [vmem:[%s5901_s8 + $0xc8] sm:$0xff] }
 0x871   : > { %1928 = vmatpush2.msra.mxu0 %v1887_v50  ;;  %v2061_v50 = vld [vmem:[%s5901_s8 + $0xc0] sm:$0xff] }
 0x872   : > { %1929 = vmatprep.subr.mxu0 %v1885_v51  ;;  %v2045_v51 = vld [vmem:[%s5901_s8 + $0x40] sm:$0xff] }
 0x873   : > { %1930 = vmatpush2.msra.mxu0 %v1884_v52  ;;  %v2060_v52 = vld [vmem:[%s5901_s8 + $0xb8] sm:$0xff] }
 0x874   : > { %1931 = vmatprep.subr.mxu0 %v1882_v53  ;;  %v2044_v53 = vld [vmem:[%s5901_s8 + $0x38] sm:$0xff] }
 0x875   : > { %1932 = vmatpush2.msra.mxu0 %v1881_v54  ;;  %v2059_v54 = vld [vmem:[%s5901_s8 + $0xb0] sm:$0xff] }
 0x876   : > { %1933 = vmatprep.subr.mxu0 %v1879_v55  ;;  %v2043_v55 = vld [vmem:[%s5901_s8 + $0x30] sm:$0xff] }
 0x877   : > { %1934 = vmatpush2.msra.mxu0 %v1878_v56  ;;  %v2058_v56 = vld [vmem:[%s5901_s8 + $0xa8] sm:$0xff] }
 0x878   : > { %1935 = vmatprep.subr.mxu0 %v1876_v57  ;;  %v2042_v57 = vld [vmem:[%s5901_s8 + $0x28] sm:$0xff] }
 0x879   : > { %1936 = vmatpush2.msra.mxu0 %v1875_v58  ;;  %v2057_v58 = vld [vmem:[%s5901_s8 + $0xa0] sm:$0xff] }
 0x87a   : > { %1937 = vmatprep.subr.mxu0 %v1873_v59  ;;  %v2041_v59 = vld [vmem:[%s5901_s8 + $0x20] sm:$0xff] }
 0x87b   : > { %1938 = vmatpush2.msra.mxu0 %v1872_v60  ;;  %v2056_v60 = vld [vmem:[%s5901_s8 + $0x98] sm:$0xff] }
 0x87c   : > { %1939 = vmatprep.subr.mxu0 %v1870_v61  ;;  %v2040_v61 = vld [vmem:[%s5901_s8 + $0x18] sm:$0xff] }
 0x87d   : > { %1940 = vmatpush2.msra.mxu0 %v1869_v62  ;;  %v2055_v62 = vld [vmem:[%s5901_s8 + $0x90] sm:$0xff] }
 0x87e   : > { %1941 = vmatprep.subr.mxu0 %v1867_v63  ;;  %v2039_v63 = vld [vmem:[%s5901_s8 + $0x10] sm:$0xff] }
 0x87f   : > { %1942 = vmatpush2.msra.mxu0 %v1866_v0  ;;  %v2054_v0 = vld [vmem:[%s5901_s8 + $0x88] sm:$0xff] }
 0x880   : > { %1943 = vmatprep.subr.mxu0 %v1864_v1  ;;  %v2038_v1 = vld [vmem:[%s5901_s8 + $0x8] sm:$0xff] }
 0x881   : > { %1944 = vmatpush2.msra.mxu0 %v1863_v2  ;;  %v2071_v2 = vld [vmem:[%s5901_s8 + $0x110] sm:$0xff] }
 0x882   : > { %1945 = vmatprep.subr.mxu0 %v1861_v3  ;;  %v2053_v3 = vld [vmem:[%s5901_s8 + $0x80] sm:$0xff] }
 0x883   : > { %1946 = vmatpush2.msra.mxu0 %v1860_v4  ;;  %v2037_v4 = vld [vmem:[%s5901_s8] sm:$0xff] }
 0x884   : > { %1947 = vmatprep.subr.mxu0 %v1858_v6  ;;  %v2070_v6 = vld [vmem:[%s5901_s8 + $0x108] sm:$0xff] }
 0x885   : > { %1948 = vmatpush2.msra.mxu0 %v1857_v7  ;;  %v2069_v7 = vld [vmem:[%s5901_s8 + $0x100] sm:$0xff] }
 0x886   : > { %1949 = vmatprep.subr.mxu0 %v1855_v5 }
 0x887   : > { %1950 = vmatpush2.msra.mxu0 %v1854_v10 }
 0x888   : > { %1951 = vmatprep.subr.mxu0 %v1852_v11 }
 0x889   : > { %1952 = vmatpush2.msra.mxu0 %v1851_v13 }
 0x88a   : > { %1953 = vmatprep.subr.mxu0 %v1849_v8 }
 0x88b   : > { %1954 = vmatpush2.msra.mxu0 %v1848_v15  ;;  %v2245_v15 = vld [vmem:[%s5902_s9 + $0x50] sm:$0xff] }
 0x88c   : > { %1955 = vmatprep.subr.mxu0 %v1846_v19  ;;  %v2242_v19 = vld [vmem:[%s5902_s9 + $0x38] sm:$0xff] }
 0x88d   : > { %1956 = vmatpush2.msra.mxu0 %v1845_v21  ;;  %v2239_v21 = vld [vmem:[%s5902_s9 + $0x20] sm:$0xff] }
 0x88e   : > { %3891 = vmatprep.subr.mxu0 %v2072_v26 }
 0x8c8   : > { %v3388_v23 = vpop.permute.xlu0 %3387 }
 0x8c9   : > { %v3390_v24 = vsel %vm1723_vm5, %v3388_v23, 0.0  ;;  %v2236_v23 = vld [vmem:[%s5902_s9 + $0x8] sm:$0xff] }
 0x8ca   : > { %3391 = vadd.xlane.f32.xlu1 %v3390_v24  ;;  %v2235_v24 = vld [vmem:[%s5902_s9] sm:$0xff] }
 0x90e   : > { %v1792_v16 = vpop.f32.mrf.mxu0 }
 0x90f   : > { %v1793_v36 = vadd.f32 %v1792_v16, %v1713_v33  ;;  %v2453_v33 = vld [vmem:[%s5912_s19 + $0x120] sm:$0xff]  ;;  %v2451_v16 = vld [vmem:[%s5912_s19 + $0x110] sm:$0xff] }
 0x910   : > { %v1794_v17 = vpop.f32.mrf.mxu0 }
 0x911   : > { %v1795_v34 = vadd.f32 %v1794_v17, %v1717_v32  ;;  %v2454_v32 = vld [vmem:[%s5912_s19 + $0x128] sm:$0xff] }
 0x912   : > { %v2450_v17 = vld [vmem:[%s5912_s19 + $0x108] sm:$0xff] }
 0x913   : > { %1957 = vmatprep.mubr.f32.mxu0 %v1795_v34  ;;  %2028 = vmatprep.mubr.f32.mxu1 %v1795_v34  ;;  %v2448_v34 = vld [vmem:[%s5912_s19 + $0xf8] sm:$0xff] }
 0x914   : > { %1958 = vmatmul.mubr.f32.vlgmr.msra.gmra.mxu0 %v1793_v36  ;;  %2029 = vmatmul.mubr.f32.vlgmr.msra.gmra.mxu1 %v1793_v36  ;;  %v2447_v36 = vld [vmem:[%s5912_s19 + $0xf0] sm:$0xff] }
 0x915   : > { %3694 = vmatpush3.msra.mxu1 %v2052_v37  ;;  %3892 = vmatpush3.msra.mxu0 %v2072_v26  ;;  %v2463_v26 = vld [vmem:[%s5912_s19 + $0x170] sm:$0xff]  ;;  %v2445_v37 = vld [vmem:[%s5912_s19 + $0xe0] sm:$0xff] }
 0x916   : > { %3695 = vmatprep.subr.mxu1 %v2067_v38  ;;  %3893 = vmatprep.subr.mxu0 %v2071_v2  ;;  %v2444_v38 = vld [vmem:[%s5912_s19 + $0xd8] sm:$0xff] }
 0x917   : > { %3696 = vmatpush3.msra.mxu1 %v2051_v39  ;;  %3894 = vmatpush3.msra.mxu0 %v2071_v2  ;;  %v2442_v39 = vld [vmem:[%s5912_s19 + $0xc8] sm:$0xff] }
 0x918   : > { %3697 = vmatprep.subr.mxu1 %v2066_v40  ;;  %3895 = vmatprep.subr.mxu0 %v2070_v6  ;;  %v2441_v40 = vld [vmem:[%s5912_s19 + $0xc0] sm:$0xff]  ;;  %v2498_v2 = vld [vmem:[%s5912_s19 + $0x288] sm:$0xff] }
 0x919   : > { %3698 = vmatpush3.msra.mxu1 %v2050_v41  ;;  %3896 = vmatpush3.msra.mxu0 %v2070_v6  ;;  %v2439_v41 = vld [vmem:[%s5912_s19 + $0xb0] sm:$0xff]  ;;  %v2493_v6 = vld [vmem:[%s5912_s19 + $0x260] sm:$0xff] }
 0x91a   : > { %3699 = vmatprep.subr.mxu1 %v2065_v42  ;;  %3897 = vmatprep.subr.mxu0 %v2069_v7  ;;  %v2438_v42 = vld [vmem:[%s5912_s19 + $0xa8] sm:$0xff] }
 0x91b   : > { %3700 = vmatpush3.msra.mxu1 %v2049_v43  ;;  %3898 = vmatpush3.msra.mxu0 %v2069_v7  ;;  %v2436_v43 = vld [vmem:[%s5912_s19 + $0x98] sm:$0xff] }
 0x91c   : > { %3701 = vmatprep.subr.mxu1 %v2064_v44  ;;  %2277 = vmatprep.subr.mxu0 %v2245_v15  ;;  %v2435_v44 = vld [vmem:[%s5912_s19 + $0x90] sm:$0xff]  ;;  %v2492_v7 = vld [vmem:[%s5912_s19 + $0x258] sm:$0xff] }
 0x91d   : > { %3702 = vmatpush3.msra.mxu1 %v2048_v45  ;;  %v2433_v45 = vld [vmem:[%s5912_s19 + $0x80] sm:$0xff] }
 0x91e   : > { %3703 = vmatprep.subr.mxu1 %v2063_v46  ;;  %v2432_v46 = vld [vmem:[%s5912_s19 + $0x78] sm:$0xff] }
 0x91f   : > { %3704 = vmatpush3.msra.mxu1 %v2047_v47  ;;  %v2430_v47 = vld [vmem:[%s5912_s19 + $0x68] sm:$0xff] }
 0x920   : > { %3705 = vmatprep.subr.mxu1 %v2062_v48  ;;  %v2429_v48 = vld [vmem:[%s5912_s19 + $0x60] sm:$0xff] }
 0x921   : > { %3706 = vmatpush3.msra.mxu1 %v2046_v49  ;;  %v2427_v49 = vld [vmem:[%s5912_s19 + $0x50] sm:$0xff] }
 0x922   : > { %3707 = vmatprep.subr.mxu1 %v2061_v50  ;;  %v2426_v50 = vld [vmem:[%s5912_s19 + $0x48] sm:$0xff] }
 0x923   : > { %3708 = vmatpush3.msra.mxu1 %v2045_v51  ;;  %v2424_v51 = vld [vmem:[%s5912_s19 + $0x38] sm:$0xff] }
 0x924   : > { %3709 = vmatprep.subr.mxu1 %v2060_v52  ;;  %v2423_v52 = vld [vmem:[%s5912_s19 + $0x30] sm:$0xff] }
 0x925   : > { %3710 = vmatpush3.msra.mxu1 %v2044_v53  ;;  %v2421_v53 = vld [vmem:[%s5912_s19 + $0x20] sm:$0xff] }
 0x926   : > { %3711 = vmatprep.subr.mxu1 %v2059_v54  ;;  %v2420_v54 = vld [vmem:[%s5912_s19 + $0x18] sm:$0xff] }
 0x927   : > { %3712 = vmatpush3.msra.mxu1 %v2043_v55  ;;  %v2418_v55 = vld [vmem:[%s5912_s19 + $0x8] sm:$0xff] }
 0x928   : > { %3713 = vmatprep.subr.mxu1 %v2058_v56  ;;  %v2417_v56 = vld [vmem:[%s5912_s19] sm:$0xff] }
 0x929   : > { %3714 = vmatpush3.msra.mxu1 %v2042_v57  ;;  %v2511_v57 = vld [vmem:[%s5912_s19 + $0x2f0] sm:$0xff] }
 0x92a   : > { %3715 = vmatprep.subr.mxu1 %v2057_v58  ;;  %v2510_v58 = vld [vmem:[%s5912_s19 + $0x2e8] sm:$0xff] }
 0x92b   : > { %3716 = vmatpush3.msra.mxu1 %v2041_v59  ;;  %v2508_v59 = vld [vmem:[%s5912_s19 + $0x2d8] sm:$0xff] }
 0x92c   : > { %3717 = vmatprep.subr.mxu1 %v2056_v60  ;;  %v2507_v60 = vld [vmem:[%s5912_s19 + $0x2d0] sm:$0xff] }
 0x92d   : > { %3718 = vmatpush3.msra.mxu1 %v2040_v61  ;;  %v2505_v61 = vld [vmem:[%s5912_s19 + $0x2c0] sm:$0xff] }
 0x92e   : > { %3719 = vmatprep.subr.mxu1 %v2055_v62  ;;  %v2504_v62 = vld [vmem:[%s5912_s19 + $0x2b8] sm:$0xff] }
 0x92f   : > { %3720 = vmatpush3.msra.mxu1 %v2039_v63  ;;  %v2502_v63 = vld [vmem:[%s5912_s19 + $0x2a8] sm:$0xff] }
 0x930   : > { %3721 = vmatprep.subr.mxu1 %v2054_v0  ;;  %v2501_v0 = vld [vmem:[%s5912_s19 + $0x2a0] sm:$0xff] }
 0x931   : > { %3722 = vmatpush3.msra.mxu1 %v2038_v1  ;;  %v2499_v1 = vld [vmem:[%s5912_s19 + $0x290] sm:$0xff] }
 0x932   : > { %3723 = vmatprep.subr.mxu1 %v2053_v3  ;;  %v2496_v3 = vld [vmem:[%s5912_s19 + $0x278] sm:$0xff] }
 0x933   : > { %3724 = vmatpush3.msra.mxu1 %v2037_v4  ;;  %v2495_v4 = vld [vmem:[%s5912_s19 + $0x270] sm:$0xff] }
 0x934   : > { %2528 = vmatprep.subr.mxu1 %v2463_v26 }
 0x9d4   : > { %v5218_v5 = vpop.f32.mrf.mxu0  ;;  %v3690_v10 = vpop.f32.mrf.mxu1 }
 0x9d5   : > { %v2034_v9 = vmul.f32 %v5218_v5, %v5218_v5 }
 0x9d6   : > { %v5220_v11 = vpop.f32.mrf.mxu0  ;;  %v3691_v12 = vpop.f32.mrf.mxu1 }
 0x9d7   : > { %v2035_v13 = vmul.f32 %v5220_v11, %v5220_v11  ;;  %v5224_v14 = vadd.f32 %v3691_v12, %v3690_v10  ;;  %2143 = vmatprep.mubr.f32.mxu1 %v5220_v11  ;;  %v2490_v10 = vld [vmem:[%s5912_s19 + $0x248] sm:$0xff]  ;;  %v2489_v12 = vld [vmem:[%s5912_s19 + $0x240] sm:$0xff] }
 0x9d8   : > { %2144 = vmatmul.mubr.f32.vlgmr.msra.gmra.mxu1 %v5218_v5 }
 0x9d9   : > { %v2036_v8 = vmul.f32 %v5224_v14, %v5224_v14  ;;  %2148 = vmatprep.mubr.f32.mxu1 %v2035_v13  ;;  %3899 = vmatprep.mubr.msk.f32.mxu0 %vm1134_vm3, %v5224_v14  ;;  %v2487_v13 = vld [vmem:[%s5912_s19 + $0x230] sm:$0xff] }
 0x9da   : > { %2529 = vmatpush1.msra.mxu1 %v2462_v27 }
 0x9db   : > { %3900 = vmatmul.mubr.msk.f32.vlgmr.msra.gmra.mxu0 %vm1134_vm3, %v2036_v8  ;;  %2530 = vmatprep.subr.mxu1 %v2460_v28  ;;  %v2486_v8 = vld [vmem:[%s5912_s19 + $0x228] sm:$0xff] }
 0x9dc   : > { %2149 = vmatmul.mubr.f32.gmra.mxu1 %v2034_v9  ;;  %2317 = vmatprep.mubr.f32.mxu0 %v3980_v35 }
 0x9dd   : > { %2278 = vmatpush1.msra.mxu0 %v2244_v18  ;;  %2531 = vmatpush1.msra.mxu1 %v2459_v29 }
 0x9de   : > { %2279 = vmatprep.subr.mxu0 %v2242_v19  ;;  %2532 = vmatprep.subr.mxu1 %v2457_v30 }
 0x9df   : > { %2280 = vmatpush1.msra.mxu0 %v2241_v20  ;;  %2533 = vmatpush1.msra.mxu1 %v2456_v31  ;;  %v2243_v31 = vld [vmem:[%s5902_s9 + $0x40] sm:$0xff] }
 0x9e0   : > { %2281 = vmatprep.subr.mxu0 %v2239_v21  ;;  %2534 = vmatprep.subr.mxu1 %v2454_v32 }
 0x9e1   : > { %2282 = vmatpush1.msra.mxu0 %v2238_v22  ;;  %2535 = vmatpush1.msra.mxu1 %v2453_v33  ;;  %v2240_v33 = vld [vmem:[%s5902_s9 + $0x28] sm:$0xff] }
 0x9e2   : > { %2283 = vmatprep.subr.mxu0 %v2236_v23  ;;  %2536 = vmatprep.subr.mxu1 %v2451_v16 }
 0x9e3   : > { %2284 = vmatpush1.msra.mxu0 %v2235_v24  ;;  %2537 = vmatpush1.msra.mxu1 %v2450_v17  ;;  %v2237_v17 = vld [vmem:[%s5902_s9 + $0x10] sm:$0xff] }
 0x9e4   : > { %3902 = vmatprep.subr.mxu0 %v5263_v25  ;;  %2538 = vmatprep.subr.mxu1 %v2448_v34  ;;  %v2483_v34 = vld [vmem:[%s5912_s19 + $0x210] sm:$0xff] }
 0x9e5   : > { %2539 = vmatpush1.msra.mxu1 %v2447_v36  ;;  %v2481_v36 = vld [vmem:[%s5912_s19 + $0x200] sm:$0xff] }
 0x9e6   : > { %2540 = vmatprep.subr.mxu1 %v2445_v37  ;;  %v2480_v37 = vld [vmem:[%s5912_s19 + $0x1f8] sm:$0xff] }
 0x9e7   : > { %2541 = vmatpush1.msra.mxu1 %v2444_v38  ;;  %v2478_v38 = vld [vmem:[%s5912_s19 + $0x1e8] sm:$0xff] }
 0x9e8   : > { %2542 = vmatprep.subr.mxu1 %v2442_v39  ;;  %v2477_v39 = vld [vmem:[%s5912_s19 + $0x1e0] sm:$0xff] }
 0x9e9   : > { %2543 = vmatpush1.msra.mxu1 %v2441_v40  ;;  %v2475_v40 = vld [vmem:[%s5912_s19 + $0x1d0] sm:$0xff] }
 0x9ea   : > { %2544 = vmatprep.subr.mxu1 %v2439_v41  ;;  %v2474_v41 = vld [vmem:[%s5912_s19 + $0x1c8] sm:$0xff] }
 0x9eb   : > { %2545 = vmatpush1.msra.mxu1 %v2438_v42  ;;  %v2472_v42 = vld [vmem:[%s5912_s19 + $0x1b8] sm:$0xff] }
 0x9ec   : > { %2546 = vmatprep.subr.mxu1 %v2436_v43  ;;  %v2471_v43 = vld [vmem:[%s5912_s19 + $0x1b0] sm:$0xff] }
 0x9ed   : > { %2547 = vmatpush1.msra.mxu1 %v2435_v44  ;;  %v2469_v44 = vld [vmem:[%s5912_s19 + $0x1a0] sm:$0xff] }
 0x9ee   : > { %2548 = vmatprep.subr.mxu1 %v2433_v45  ;;  %v2523_v45 = vld [vmem:[%s5912_s19 + $0x350] sm:$0xff] }
 0x9ef   : > { %2549 = vmatpush1.msra.mxu1 %v2432_v46  ;;  %v2468_v46 = vld [vmem:[%s5912_s19 + $0x198] sm:$0xff] }
 0x9f0   : > { %2550 = vmatprep.subr.mxu1 %v2430_v47  ;;  %v2522_v47 = vld [vmem:[%s5912_s19 + $0x348] sm:$0xff] }
 0x9f1   : > { %2551 = vmatpush1.msra.mxu1 %v2429_v48  ;;  %v2466_v48 = vld [vmem:[%s5912_s19 + $0x188] sm:$0xff] }
 0x9f2   : > { %2552 = vmatprep.subr.mxu1 %v2427_v49  ;;  %v2520_v49 = vld [vmem:[%s5912_s19 + $0x338] sm:$0xff] }
 0x9f3   : > { %2553 = vmatpush1.msra.mxu1 %v2426_v50  ;;  %v2465_v50 = vld [vmem:[%s5912_s19 + $0x180] sm:$0xff] }
 0x9f4   : > { %2554 = vmatprep.subr.mxu1 %v2424_v51  ;;  %v2519_v51 = vld [vmem:[%s5912_s19 + $0x330] sm:$0xff] }
 0x9f5   : > { %2555 = vmatpush1.msra.mxu1 %v2423_v52  ;;  %v2517_v52 = vld [vmem:[%s5912_s19 + $0x320] sm:$0xff] }
 0x9f6   : > { %2556 = vmatprep.subr.mxu1 %v2421_v53  ;;  %v2516_v53 = vld [vmem:[%s5912_s19 + $0x318] sm:$0xff] }
 0x9f7   : > { %2557 = vmatpush1.msra.mxu1 %v2420_v54  ;;  %v2514_v54 = vld [vmem:[%s5912_s19 + $0x308] sm:$0xff] }
 0x9f8   : > { %2558 = vmatprep.subr.mxu1 %v2418_v55  ;;  %v2513_v55 = vld [vmem:[%s5912_s19 + $0x300] sm:$0xff] }
 0x9f9   : > { %2559 = vmatpush1.msra.mxu1 %v2417_v56  ;;  %v2512_v56 = vld [vmem:[%s5912_s19 + $0x2f8] sm:$0xff] }
 0x9fa   : > { %2560 = vmatprep.subr.mxu1 %v2511_v57 }
 0x9fb   : > { %2561 = vmatpush2.msra.mxu1 %v2510_v58 }
 0x9fc   : > { %2562 = vmatprep.subr.mxu1 %v2508_v59 }
 0x9fd   : > { %2563 = vmatpush2.msra.mxu1 %v2507_v60 }
 0x9fe   : > { %2564 = vmatprep.subr.mxu1 %v2505_v61 }
 0x9ff   : > { %2565 = vmatpush2.msra.mxu1 %v2504_v62 }
 0xa00   : > { %2566 = vmatprep.subr.mxu1 %v2502_v63 }
 0xa01   : > { %2567 = vmatpush2.msra.mxu1 %v2501_v0 }
 0xa02   : > { %2568 = vmatprep.subr.mxu1 %v2499_v1 }
 0xa03   : > { %2569 = vmatpush2.msra.mxu1 %v2498_v2 }
 0xa04   : > { %2570 = vmatprep.subr.mxu1 %v2496_v3 }
 0xa05   : > { %2571 = vmatpush2.msra.mxu1 %v2495_v4 }
 0xa06   : > { %2572 = vmatprep.subr.mxu1 %v2493_v6 }
 0xa07   : > { %2573 = vmatpush2.msra.mxu1 %v2492_v7 }
 0xa08   : > { %2574 = vmatprep.subr.mxu1 %v2490_v10 }
 0xa09   : > { %2575 = vmatpush2.msra.mxu1 %v2489_v12 }
 0xa0a   : > { %2576 = vmatprep.subr.mxu1 %v2487_v13 }
 0xa0b   : > { %2577 = vmatpush2.msra.mxu1 %v2486_v8  ;;  %v2509_v8 = vld [vmem:[%s5912_s19 + $0x2e0] sm:$0xff] }
 0xa98   : > { %v3725_v9 = vpop.f32.mrf.mxu1 }
 0xa9a   : > { %v3726_v15 = vpop.f32.mrf.mxu1 }
 0xa9b   : > { %v3727_v18 = vadd.f32 %v3726_v15, %v3725_v9  ;;  %v3901_v19 = vpop.f32.mrf.mxu0  ;;  %v2506_v9 = vld [vmem:[%s5912_s19 + $0x2c8] sm:$0xff] }
 0xa9c   : > { %v3728_v20 = vpop.f32.mrf.mxu1  ;;  %v2458_v15 = vld [vmem:[%s5912_s19 + $0x148] sm:$0xff] }
 0xa9d   : > { %v2220_v21 = vpop.f32.mrf.mxu0 }
 0xa9e   : > { %v2221_v22 = vadd.f32 %v3727_v18, %v2220_v21  ;;  %v3729_v23 = vpop.f32.mrf.mxu1  ;;  %v2503_v18 = vld [vmem:[%s5912_s19 + $0x2b0] sm:$0xff]  ;;  %v2452_v21 = vld [vmem:[%s5912_s19 + $0x118] sm:$0xff] }
 0xa9f   : > { %v3730_v24 = vadd.f32 %v3729_v23, %v3728_v20  ;;  %v2500_v20 = vld [vmem:[%s5912_s19 + $0x298] sm:$0xff]  ;;  %v2449_v23 = vld [vmem:[%s5912_s19 + $0x100] sm:$0xff] }
 0xaa0   : > { %v2229_v26 = vmul.f32 %v2221_v22, %v2221_v22  ;;  %v2233_v32 = vsub.f32 0.0, %v2221_v22  ;;  %v2497_v22 = vld [vmem:[%s5912_s19 + $0x280] sm:$0xff] }
 0xaa1   : > { %v2226_v27 = vadd.f32 %v3901_v19, %v3730_v24  ;;  %v2455_v19 = vld [vmem:[%s5912_s19 + $0x130] sm:$0xff]  ;;  %v2494_v24 = vld [vmem:[%s5912_s19 + $0x268] sm:$0xff] }
 0xaa3   : > { %v2230_v28 = vsub.f32 %v2226_v27, %v2229_v26  ;;  %v2446_v26 = vld [vmem:[%s5912_s19 + $0xe8] sm:$0xff]  ;;  %v2491_v27 = vld [vmem:[%s5912_s19 + $0x250] sm:$0xff] }
 0xaa5   : > { %v2231_v29 = vadd.f32 1e-05, %v2230_v28  ;;  %v2443_v28 = vld [vmem:[%s5912_s19 + $0xd0] sm:$0xff] }
 0xaa7   : > { %3965 = vrsqrt.f32 %v2231_v29  ;;  %v2488_v29 = vld [vmem:[%s5912_s19 + $0x238] sm:$0xff] }
 0xab4   : > { %v3966_v30 = vpop.eup %3965 }
 0xab5   : > { %3518 = vmatmul.mubr.msk.f32.vlgmr.msra.gmra.mxu0 %vm1134_vm3, %v3966_v30  ;;  %v2234_v16 = vmul.f32 %v3966_v30, %v2233_v32  ;;  %v2437_v32 = vld [vmem:[%s5912_s19 + $0xa0] sm:$0xff] }
 0xab6   : > { %3903 = vmatpush3.msra.mxu0 %v5263_v25  ;;  %2323 = vmatprep.mubr.f32.mxu0 %v3980_v35  ;;  %v2484_v25 = vld [vmem:[%s5912_s19 + $0x218] sm:$0xff] }
 0xab7   : > { %3904 = vmatprep.subr.mxu0 %v2243_v31  ;;  %2578 = vmatprep.subr.mxu1 %v2484_v25  ;;  %v2431_v25 = vld [vmem:[%s5912_s19 + $0x70] sm:$0xff] }
 0xab8   : > { %3905 = vmatpush3.msra.mxu0 %v2243_v31  ;;  %2579 = vmatpush2.msra.mxu1 %v2483_v34  ;;  %v2485_v31 = vld [vmem:[%s5912_s19 + $0x220] sm:$0xff]  ;;  %v2476_v34 = vld [vmem:[%s5912_s19 + $0x1d8] sm:$0xff] }
 0xab9   : > { %3906 = vmatprep.subr.mxu0 %v2240_v33  ;;  %3519 = vmatmul.mubr.msk.f32.gmra.mxu0 %vm1134_vm3, %v2234_v16 }
 0xaba   : > { %3907 = vmatpush3.msra.mxu0 %v2240_v33  ;;  %3910 = vmatprep.mubr.msk.f32.mxu0 %vm1134_vm3, %v3966_v30  ;;  %v2440_v30 = vld [vmem:[%s5912_s19 + $0xb8] sm:$0xff]  ;;  %v2482_v33 = vld [vmem:[%s5912_s19 + $0x208] sm:$0xff] }
 0xabb   : > { %3908 = vmatprep.subr.mxu0 %v2237_v17  ;;  %2580 = vmatprep.subr.mxu1 %v2481_v36  ;;  %v2428_v36 = vld [vmem:[%s5912_s19 + $0x58] sm:$0xff] }
 0xabc   : > { %3909 = vmatpush3.msra.mxu0 %v2237_v17  ;;  %2581 = vmatpush2.msra.mxu1 %v2480_v37  ;;  %v2479_v17 = vld [vmem:[%s5912_s19 + $0x1f0] sm:$0xff]  ;;  %v2473_v37 = vld [vmem:[%s5912_s19 + $0x1c0] sm:$0xff] }
 0xabd   : > { %3911 = vmatmul.mubr.msk.f32.vlgmr.msra.gmra.mxu0 %vm1134_vm3, %v2234_v16  ;;  %2582 = vmatprep.subr.mxu1 %v2478_v38  ;;  %v2434_v16 = vld [vmem:[%s5912_s19 + $0x88] sm:$0xff]  ;;  %v2425_v38 = vld [vmem:[%s5912_s19 + $0x40] sm:$0xff] }
 0xabe   : > { %2663 = vmatprep.mubr.f32.mxu0 %v3980_v35  ;;  %2583 = vmatpush2.msra.mxu1 %v2477_v39  ;;  %v2470_v39 = vld [vmem:[%s5912_s19 + $0x1a8] sm:$0xff] }
 0xabf   : > { %2584 = vmatprep.subr.mxu1 %v2475_v40  ;;  %2623 = vmatprep.subr.mxu0 %v2523_v45  ;;  %v2422_v40 = vld [vmem:[%s5912_s19 + $0x28] sm:$0xff] }
 0xac0   : > { %2585 = vmatpush2.msra.mxu1 %v2474_v41  ;;  %2624 = vmatpush1.msra.mxu0 %v2522_v47  ;;  %v2467_v41 = vld [vmem:[%s5912_s19 + $0x190] sm:$0xff]  ;;  %v2518_v45 = vld [vmem:[%s5912_s19 + $0x328] sm:$0xff]  ;;  %v2844_v47 = vld [vmem:[%s5903_s10 + $0xf8] sm:$0xff] }
 0xac1   : > { %2586 = vmatprep.subr.mxu1 %v2472_v42  ;;  %2625 = vmatprep.subr.mxu0 %v2520_v49  ;;  %v2419_v42 = vld [vmem:[%s5912_s19 + $0x10] sm:$0xff] }
 0xac2   : > { %2587 = vmatpush2.msra.mxu1 %v2471_v43  ;;  %2626 = vmatpush1.msra.mxu0 %v2519_v51  ;;  %v2524_v43 = vld [vmem:[%s5912_s19 + $0x358] sm:$0xff]  ;;  %v2843_v49 = vld [vmem:[%s5903_s10 + $0xf0] sm:$0xff]  ;;  %v2842_v51 = vld [vmem:[%s5903_s10 + $0xe8] sm:$0xff] }
 0xac3   : > { %2588 = vmatprep.subr.mxu1 %v2469_v44  ;;  %2627 = vmatprep.subr.mxu0 %v2517_v52  ;;  %v2521_v44 = vld [vmem:[%s5912_s19 + $0x340] sm:$0xff]  ;;  %v2826_v52 = vld [vmem:[%s5903_s10 + $0x68] sm:$0xff] }
 0xac4   : > { %2589 = vmatpush2.msra.mxu1 %v2468_v46  ;;  %2628 = vmatpush1.msra.mxu0 %v2516_v53  ;;  %v2515_v46 = vld [vmem:[%s5912_s19 + $0x310] sm:$0xff]  ;;  %v2841_v53 = vld [vmem:[%s5903_s10 + $0xe0] sm:$0xff] }
 0xac5   : > { %2590 = vmatprep.subr.mxu1 %v2466_v48  ;;  %2629 = vmatprep.subr.mxu0 %v2514_v54  ;;  %v2828_v48 = vld [vmem:[%s5903_s10 + $0x78] sm:$0xff]  ;;  %v2825_v54 = vld [vmem:[%s5903_s10 + $0x60] sm:$0xff] }
 0xac6   : > { %2591 = vmatpush2.msra.mxu1 %v2465_v50  ;;  %2630 = vmatpush1.msra.mxu0 %v2513_v55  ;;  %v2827_v50 = vld [vmem:[%s5903_s10 + $0x70] sm:$0xff]  ;;  %v2840_v55 = vld [vmem:[%s5903_s10 + $0xd8] sm:$0xff] }
 0xac7   : > { %3743 = vmatprep.subr.mxu0 %v2512_v56  ;;  %v2824_v56 = vld [vmem:[%s5903_s10 + $0x58] sm:$0xff] }
 0xb75   : > { %v2319_v57 = vpop.f32.mrf.mxu0 }
 0xb76   : > { %v2405_v59 = vmul.f32 %v2319_v57, %v5218_v5  ;;  %v2839_v57 = vld [vmem:[%s5903_s10 + $0xd0] sm:$0xff] }
 0xb77   : > { %v2321_v58 = vpop.f32.mrf.mxu0 }
 0xb78   : > { %v2406_v61 = vmul.f32 %v2321_v58, %v5220_v11  ;;  %v2464_v11 = vld [vmem:[%s5912_s19 + $0x178] sm:$0xff]  ;;  %v2823_v58 = vld [vmem:[%s5903_s10 + $0x50] sm:$0xff] }
 0xb79   : > { %v2325_v60 = vpop.f32.mrf.mxu0 }
 0xb7a   : > { %v2408_v62 = vadd.f32 %v2405_v59, %v2325_v60  ;;  %v2838_v59 = vld [vmem:[%s5903_s10 + $0xc8] sm:$0xff] }
 0xb7b   : > { %v2327_v63 = vpop.f32.mrf.mxu0  ;;  %v2822_v60 = vld [vmem:[%s5903_s10 + $0x48] sm:$0xff] }
 0xb7c   : > { %v2409_v0 = vadd.f32 %v2406_v61, %v2327_v63  ;;  %v2411_v1 = vmul.f32 0.01, %v2408_v62  ;;  %v2837_v61 = vld [vmem:[%s5903_s10 + $0xc0] sm:$0xff]  ;;  %v2836_v63 = vld [vmem:[%s5903_s10 + $0xb8] sm:$0xff] }
 0xb7d   : > { %v3912_v2 = vpop.f32.mrf.mxu0 }
 0xb7e   : > { %v2412_v3 = vmul.f32 0.01, %v2409_v0  ;;  %v5504_v10 = vmax.f32 %v2408_v62, %v2411_v1  ;;  %v2821_v62 = vld [vmem:[%s5903_s10 + $0x40] sm:$0xff]  ;;  %v2835_v1 = vld [vmem:[%s5903_s10 + $0xb0] sm:$0xff] }
 0xb7f   : > { %v2396_v4 = vpop.f32.mrf.mxu0 }
 0xb80   : > { %v2415_v6 = vmax.f32 %v2409_v0, %v2412_v3  ;;  %v2407_v7 = vmul.f32 %v5224_v14, %v2396_v4  ;;  %v2461_v14 = vld [vmem:[%s5912_s19 + $0x160] sm:$0xff]  ;;  %v2820_v0 = vld [vmem:[%s5903_s10 + $0x38] sm:$0xff]  ;;  %v2834_v3 = vld [vmem:[%s5903_s10 + $0xa8] sm:$0xff] }
 0xb81   : > { %v2818_v4 = vld [vmem:[%s5903_s10 + $0x28] sm:$0xff] }
 0xb82   : > { %v2410_v12 = vadd.f32 %v3912_v2, %v2407_v7  ;;  %2592 = vmatprep.mubr.f32.mxu1 %v2415_v6  ;;  %v2819_v2 = vld [vmem:[%s5903_s10 + $0x30] sm:$0xff]  ;;  %v2817_v7 = vld [vmem:[%s5903_s10 + $0x20] sm:$0xff] }
 0xb83   : > { %2593 = vmatmul.mubr.f32.vlgmr.msra.gmra.mxu1 %v5504_v10 }
 0xb84   : > { %v2413_v5 = vmul.f32 0.01, %v2410_v12 }
 0xb86   : > { %v5507_v13 = vmax.f32 %v2410_v12, %v2413_v5  ;;  %v2816_v12 = vld [vmem:[%s5903_s10 + $0x18] sm:$0xff]  ;;  %v2831_v5 = vld [vmem:[%s5903_s10 + $0x90] sm:$0xff] }
 0xb88   : > { %3522 = vmatmul.mubr.msk.f32.vlgmr.msra.gmra.mxu0 %vm1134_vm3, %v5507_v13 }
 0xb89   : > { %3744 = vmatpush3.msra.mxu0 %v2464_v11  ;;  %2734 = vmatprep.mubr.f32.mxu0 %v2415_v6  ;;  %v2833_v6 = vld [vmem:[%s5903_s10 + $0xa0] sm:$0xff]  ;;  %v2830_v11 = vld [vmem:[%s5903_s10 + $0x88] sm:$0xff] }
 0xb8a   : > { %3745 = vmatprep.subr.mxu0 %v2509_v8  ;;  %v2814_v8 = vld [vmem:[%s5903_s10 + $0x8] sm:$0xff] }
 0xb8b   : > { %3746 = vmatpush3.msra.mxu0 %v2461_v14  ;;  %v2829_v14 = vld [vmem:[%s5903_s10 + $0x80] sm:$0xff] }
 0xb8c   : > { %3747 = vmatprep.subr.mxu0 %v2506_v9  ;;  %v2813_v9 = vld [vmem:[%s5903_s10] sm:$0xff] }
 0xb8d   : > { %3748 = vmatpush3.msra.mxu0 %v2458_v15  ;;  %v2846_v15 = vld [vmem:[%s5903_s10 + $0x108] sm:$0xff] }
 0xb8e   : > { %3749 = vmatprep.subr.mxu0 %v2503_v18  ;;  %3924 = vmatprep.subr.mxu1 %v2846_v15  ;;  %v2845_v18 = vld [vmem:[%s5903_s10 + $0x100] sm:$0xff] }
 0xb8f   : > { %3750 = vmatpush3.msra.mxu0 %v2455_v19  ;;  %3925 = vmatpush3.msra.mxu1 %v2846_v15  ;;  %v3205_v15 = vld [vmem:[%s5913_s20 + $0x98] sm:$0xff] }
 0xb90   : > { %3751 = vmatprep.subr.mxu0 %v2500_v20  ;;  %3926 = vmatprep.subr.mxu1 %v2845_v18 }
 0xb91   : > { %3752 = vmatpush3.msra.mxu0 %v2452_v21  ;;  %3927 = vmatpush3.msra.mxu1 %v2845_v18  ;;  %v3189_v18 = vld [vmem:[%s5913_s20 + $0x18] sm:$0xff] }
 0xb92   : > { %3753 = vmatprep.subr.mxu0 %v2497_v22 }
 0xb93   : > { %3754 = vmatpush3.msra.mxu0 %v2449_v23 }
 0xb94   : > { %3755 = vmatprep.subr.mxu0 %v2494_v24 }
 0xb95   : > { %3756 = vmatpush3.msra.mxu0 %v2446_v26 }
 0xb96   : > { %3757 = vmatprep.subr.mxu0 %v2491_v27 }
 0xb97   : > { %3758 = vmatpush3.msra.mxu0 %v2443_v28 }
 0xb98   : > { %3759 = vmatprep.subr.mxu0 %v2488_v29 }
 0xb99   : > { %3760 = vmatpush3.msra.mxu0 %v2440_v30 }
 0xb9a   : > { %3761 = vmatprep.subr.mxu0 %v2485_v31 }
 0xb9b   : > { %3762 = vmatpush3.msra.mxu0 %v2437_v32 }
 0xb9c   : > { %3763 = vmatprep.subr.mxu0 %v2482_v33 }
 0xb9d   : > { %3764 = vmatpush3.msra.mxu0 %v2434_v16 }
 0xb9e   : > { %3765 = vmatprep.subr.mxu0 %v2479_v17  ;;  %v3014_v17 = vld [vmem:[%s5904_s11 + $0x20] sm:$0xff] }
 0xb9f   : > { %3766 = vmatpush3.msra.mxu0 %v2431_v25  ;;  %3050 = vmatprep.subr.mxu1 %v3014_v17  ;;  %v3013_v25 = vld [vmem:[%s5904_s11 + $0x18] sm:$0xff] }
 0xba0   : > { %3767 = vmatprep.subr.mxu0 %v2476_v34  ;;  %v3011_v34 = vld [vmem:[%s5904_s11 + $0x8] sm:$0xff] }
 0xba1   : > { %3768 = vmatpush3.msra.mxu0 %v2428_v36  ;;  %v3010_v36 = vld [vmem:[%s5904_s11] sm:$0xff] }
 0xba2   : > { %3769 = vmatprep.subr.mxu0 %v2473_v37  ;;  %v3015_v37 = vld [vmem:[%s5904_s11 + $0x28] sm:$0xff] }
 0xba3   : > { %3770 = vmatpush3.msra.mxu0 %v2425_v38 }
 0xba4   : > { %3771 = vmatprep.subr.mxu0 %v2470_v39 }
 0xba5   : > { %3772 = vmatpush3.msra.mxu0 %v2422_v40 }
 0xba6   : > { %3773 = vmatprep.subr.mxu0 %v2467_v41 }
 0xba7   : > { %3774 = vmatpush3.msra.mxu0 %v2419_v42 }
 0xba8   : > { %2735 = vmatmul.mubr.f32.vlgmr.msra.gmra.mxu0 %v5504_v10  ;;  %3913 = vmatprep.subr.mxu0 %v3980_v35  ;;  %v2832_v10 = vld [vmem:[%s5903_s10 + $0x98] sm:$0xff] }
 0xba9   : > { %3914 = vmatpush3.msra.mxu0 %v2524_v43  ;;  %3921 = vmatprep.mubr.msk.f32.mxu0 %vm3983_vm6, %v3980_v35 }
 0xbaa   : > { %3915 = vmatprep.subr.mxu0 %v3980_v35 }
 0xbab   : > { %3916 = vmatpush3.msra.mxu0 %v2521_v44 }
 0xbac   : > { %3917 = vmatprep.subr.mxu0 %v3980_v35 }
 0xbad   : > { %3918 = vmatpush3.msra.mxu0 %v2518_v45 }
 0xbae   : > { %3919 = vmatprep.subr.mxu0 %v3980_v35 }
 0xbaf   : > { %3920 = vmatpush3.msra.mxu0 %v2515_v46 }
 0xbb0   : > { %3922 = vmatmul.mubr.msk.f32.vlgmr.msra.gmra.mxu0 %vm1134_vm3, %v5507_v13  ;;  %3783 = vmatprep.subr.mxu0 %v2844_v47  ;;  %v2815_v13 = vld [vmem:[%s5903_s10 + $0x10] sm:$0xff] }
 0xbb1   : > { %3784 = vmatpush3.msra.mxu0 %v2828_v48 }
 0xbb2   : > { %3785 = vmatprep.subr.mxu0 %v2843_v49 }
 0xbb3   : > { %3786 = vmatpush3.msra.mxu0 %v2827_v50 }
 0xbb4   : > { %3787 = vmatprep.subr.mxu0 %v2842_v51 }
 0xbb5   : > { %3788 = vmatpush3.msra.mxu0 %v2826_v52  ;;  %v3012_v52 = vld [vmem:[%s5904_s11 + $0x10] sm:$0xff] }
 0xbb6   : > { %3789 = vmatprep.subr.mxu0 %v2841_v53 }
 0xbb7   : > { %3790 = vmatpush3.msra.mxu0 %v2825_v54  ;;  %v3217_v54 = vld [vmem:[%s5913_s20 + $0xf8] sm:$0xff] }
 0xbb8   : > { %3791 = vmatprep.subr.mxu0 %v2840_v55 }
 0xbb9   : > { %3792 = vmatpush3.msra.mxu0 %v2824_v56  ;;  %v3201_v56 = vld [vmem:[%s5913_s20 + $0x78] sm:$0xff] }
 0xbba   : > { %3793 = vmatprep.subr.mxu0 %v2839_v57  ;;  %v3216_v57 = vld [vmem:[%s5913_s20 + $0xf0] sm:$0xff] }
 0xbbb   : > { %3794 = vmatpush3.msra.mxu0 %v2823_v58  ;;  %v3200_v58 = vld [vmem:[%s5913_s20 + $0x70] sm:$0xff] }
 0xbbc   : > { %3795 = vmatprep.subr.mxu0 %v2838_v59  ;;  %v3215_v59 = vld [vmem:[%s5913_s20 + $0xe8] sm:$0xff] }
 0xbbd   : > { %3796 = vmatpush3.msra.mxu0 %v2822_v60  ;;  %v3199_v60 = vld [vmem:[%s5913_s20 + $0x68] sm:$0xff] }
 0xbbe   : > { %3797 = vmatprep.subr.mxu0 %v2837_v61  ;;  %v3214_v61 = vld [vmem:[%s5913_s20 + $0xe0] sm:$0xff] }
 0xbbf   : > { %3798 = vmatpush3.msra.mxu0 %v2821_v62  ;;  %v3198_v62 = vld [vmem:[%s5913_s20 + $0x60] sm:$0xff] }
 0xbc0   : > { %3799 = vmatprep.subr.mxu0 %v2836_v63  ;;  %v3213_v63 = vld [vmem:[%s5913_s20 + $0xd8] sm:$0xff] }
 0xbc1   : > { %3800 = vmatpush3.msra.mxu0 %v2820_v0  ;;  %v3197_v0 = vld [vmem:[%s5913_s20 + $0x58] sm:$0xff] }
 0xbc2   : > { %3801 = vmatprep.subr.mxu0 %v2835_v1  ;;  %v3212_v1 = vld [vmem:[%s5913_s20 + $0xd0] sm:$0xff] }
 0xbc3   : > { %3802 = vmatpush3.msra.mxu0 %v2819_v2  ;;  %v3196_v2 = vld [vmem:[%s5913_s20 + $0x50] sm:$0xff] }
 0xbc4   : > { %3803 = vmatprep.subr.mxu0 %v2834_v3  ;;  %v3211_v3 = vld [vmem:[%s5913_s20 + $0xc8] sm:$0xff] }
 0xbc5   : > { %3804 = vmatpush3.msra.mxu0 %v2818_v4  ;;  %v3195_v4 = vld [vmem:[%s5913_s20 + $0x48] sm:$0xff] }
 0xbc6   : > { %3805 = vmatprep.subr.mxu0 %v2833_v6  ;;  %v3210_v6 = vld [vmem:[%s5913_s20 + $0xc0] sm:$0xff] }
 0xbc7   : > { %3806 = vmatpush3.msra.mxu0 %v2817_v7  ;;  %v3194_v7 = vld [vmem:[%s5913_s20 + $0x40] sm:$0xff] }
 0xbc8   : > { %3807 = vmatprep.subr.mxu0 %v2832_v10  ;;  %v3209_v10 = vld [vmem:[%s5913_s20 + $0xb8] sm:$0xff] }
 0xbc9   : > { %3808 = vmatpush3.msra.mxu0 %v2816_v12  ;;  %v3193_v12 = vld [vmem:[%s5913_s20 + $0x38] sm:$0xff] }
 0xbca   : > { %3809 = vmatprep.subr.mxu0 %v2831_v5  ;;  %v3208_v5 = vld [vmem:[%s5913_s20 + $0xb0] sm:$0xff] }
 0xbcb   : > { %3810 = vmatpush3.msra.mxu0 %v2815_v13  ;;  %v3192_v13 = vld [vmem:[%s5913_s20 + $0x30] sm:$0xff] }
 0xbcc   : > { %3811 = vmatprep.subr.mxu0 %v2830_v11  ;;  %v3207_v11 = vld [vmem:[%s5913_s20 + $0xa8] sm:$0xff] }
 0xbcd   : > { %3812 = vmatpush3.msra.mxu0 %v2814_v8  ;;  %v3191_v8 = vld [vmem:[%s5913_s20 + $0x28] sm:$0xff] }
 0xbce   : > { %3813 = vmatprep.subr.mxu0 %v2829_v14  ;;  %v3206_v14 = vld [vmem:[%s5913_s20 + $0xa0] sm:$0xff] }
 0xbcf   : > { %3814 = vmatpush3.msra.mxu0 %v2813_v9  ;;  %v3190_v9 = vld [vmem:[%s5913_s20 + $0x20] sm:$0xff] }
 0xbd0   : > { %3938 = vmatprep.subr.mxu0 %v3980_v35 }
 0xc43   : > { %v2594_v19 = vpop.f32.mrf.mxu1 }
 0xc45   : > { %v2596_v21 = vpop.f32.mrf.mxu1 }
 0xc48   : > { %v2665_v20 = vpop.f32.mrf.mxu0 }
 0xc49   : > { %v5730_v24 = vadd.f32 %v2665_v20, %v2594_v19  ;;  %v3204_v19 = vld [vmem:[%s5913_s20 + $0x90] sm:$0xff] }
 0xc4a   : > { %v2667_v22 = vpop.f32.mrf.mxu0  ;;  %v3188_v20 = vld [vmem:[%s5913_s20 + $0x10] sm:$0xff] }
 0xc4b   : > { %v5728_v23 = vadd.f32 %v2667_v22, %v2596_v21  ;;  %v2810_v27 = vmul.f32 %v5730_v24, %v5730_v24  ;;  %v3203_v21 = vld [vmem:[%s5913_s20 + $0x88] sm:$0xff] }
 0xc4c   : > { %v3187_v22 = vld [vmem:[%s5913_s20 + $0x8] sm:$0xff] }
 0xc4d   : > { %2918 = vmatprep.mubr.f32.mxu0 %v5728_v23  ;;  %v2811_v26 = vmul.f32 %v5728_v23, %v5728_v23 }
 0xc4e   : > { %2919 = vmatmul.mubr.f32.vlgmr.msra.gmra.mxu0 %v5730_v24 }
 0xc4f   : > { %2923 = vmatprep.mubr.f32.mxu0 %v2811_v26  ;;  %v3202_v26 = vld [vmem:[%s5913_s20 + $0x80] sm:$0xff] }
 0xc52   : > { %2924 = vmatmul.mubr.f32.gmra.mxu0 %v2810_v27  ;;  %v3186_v27 = vld [vmem:[%s5913_s20] sm:$0xff] }
 0xc53   : > { %3942 = vmatprep.mubr.msk.f32.mxu0 %vm3983_vm6, %v3980_v35 }
 0xc68   : > { %v3775_v28 = vpop.f32.mrf.mxu0 }
 0xc6a   : > { %v3776_v29 = vpop.f32.mrf.mxu0 }
 0xc6b   : > { %v3777_v30 = vadd.f32 %v3776_v29, %v3775_v28  ;;  %v3219_v28 = vld [vmem:[%s5913_s20 + $0x108] sm:$0xff]  ;;  %v3218_v29 = vld [vmem:[%s5913_s20 + $0x100] sm:$0xff] }
 0xc6c   : > { %3939 = vmatpush3.msra.mxu0 %v3219_v28 }
 0xc6d   : > { %3940 = vmatprep.subr.mxu0 %v3980_v35 }
 0xc6e   : > { %3941 = vmatpush3.msra.mxu0 %v3218_v29 }
 0xc70   : > { %v2806_v31 = vpop.f32.mrf.mxu0 }
 0xc71   : > { %v5740_v32 = vadd.f32 %v3777_v30, %v2806_v31 }
 0xc72   : > { %v3923_v33 = vpop.f32.mrf.mxu0 }
 0xc73   : > { %v2812_v16 = vmul.f32 %v5740_v32, %v5740_v32  ;;  %3928 = vmatprep.mubr.msk.f32.mxu1 %vm2847_vm4, %v5740_v32 }
 0xc75   : > { %3929 = vmatmul.mubr.msk.f32.vlgmr.msra.gmra.mxu1 %vm2847_vm4, %v2812_v16 }
 0xc76   : > { %3086 = vmatprep.mubr.f32.mxu1 %v3980_v35  ;;  %3051 = vmatpush1.msra.mxu1 %v3013_v25 }
 0xc77   : > { %3052 = vmatprep.subr.mxu1 %v3011_v34 }
 0xc78   : > { %3053 = vmatpush1.msra.mxu1 %v3010_v36 }
 0xc79   : > { %3931 = vmatprep.subr.mxu1 %v3015_v37 }
 0xd0e   : > { %v3815_v38 = vpop.f32.mrf.mxu0 }
 0xd10   : > { %v3816_v39 = vpop.f32.mrf.mxu0 }
 0xd11   : > { %v3817_v43 = vadd.f32 %v3816_v39, %v3815_v38 }
 0xd12   : > { %v3818_v40 = vpop.f32.mrf.mxu0 }
 0xd14   : > { %v3819_v41 = vpop.f32.mrf.mxu0 }
 0xd15   : > { %v3820_v45 = vadd.f32 %v3819_v41, %v3818_v40 }
 0xd35   : > { %v3930_v42 = vpop.f32.mrf.mxu1 }
 0xd36   : > { %v3001_v47 = vadd.f32 %v3930_v42, %v3820_v45 }
 0xd37   : > { %v2995_v44 = vpop.f32.mrf.mxu1 }
 0xd38   : > { %v2996_v46 = vadd.f32 %v3817_v43, %v2995_v44 }
 0xd3a   : > { %v3004_v48 = vmul.f32 %v2996_v46, %v2996_v46  ;;  %v3008_v53 = vsub.f32 0.0, %v2996_v46  ;;  %v3530_v46 = vld [vmem:[%s5914_s21] ss:$0 sm:$0xff] }
 0xd3c   : > { %v3005_v49 = vsub.f32 %v3001_v47, %v3004_v48 }
 0xd3e   : > { %v3006_v50 = vadd.f32 1e-05, %v3005_v49 }
 0xd40   : > { %3967 = vrsqrt.f32 %v3006_v50 }
 0xd4d   : > { %v3968_v51 = vpop.eup %3967 }
 0xd4e   : > { %3526 = vmatmul.mubr.msk.f32.vlgmr.msra.gmra.mxu1 %vm2847_vm4, %v3968_v51  ;;  %v3009_v55 = vmul.f32 %v3968_v51, %v3008_v53 }
 0xd4f   : > { %3932 = vmatpush3.msra.mxu1 %v3015_v37  ;;  %3092 = vmatprep.mubr.f32.mxu1 %v3980_v35 }
 0xd50   : > { %3933 = vmatprep.subr.mxu1 %v3012_v52 }
 0xd51   : > { %3934 = vmatpush3.msra.mxu1 %v3012_v52  ;;  %v3971_v52 = vld [vmem:[%s4130_s24] sm:$0xff] }
 0xd52   : > { %3527 = vmatmul.mubr.msk.f32.gmra.mxu1 %vm2847_vm4, %v3009_v55  ;;  %3829 = vmatprep.subr.mxu1 %v3217_v54 }
 0xd53   : > { %3935 = vmatprep.mubr.msk.f32.mxu1 %vm2847_vm4, %v3968_v51 }
 0xd56   : > { %3936 = vmatmul.mubr.msk.f32.vlgmr.msra.gmra.mxu1 %vm2847_vm4, %v3009_v55 }
 0xd57   : > { %3830 = vmatpush3.msra.mxu1 %v3201_v56  ;;  %v3392_v56 = vpop.xlane.xlu1 %3391 }
 0xd58   : > { %3831 = vmatprep.subr.mxu1 %v3216_v57  ;;  %v3393_v57 = vmul.f32 -0.5, %v3392_v56 }
 0xd59   : > { %3832 = vmatpush3.msra.mxu1 %v3200_v58 }
 0xd5a   : > { %3833 = vmatprep.subr.mxu1 %v3215_v59 }
 0xd5b   : > { %3834 = vmatpush3.msra.mxu1 %v3199_v60 }
 0xd5c   : > { %3835 = vmatprep.subr.mxu1 %v3214_v61 }
 0xd5d   : > { %3836 = vmatpush3.msra.mxu1 %v3198_v62 }
 0xd5e   : > { %3837 = vmatprep.subr.mxu1 %v3213_v63 }
 0xd5f   : > { %3838 = vmatpush3.msra.mxu1 %v3197_v0 }
 0xd60   : > { %3839 = vmatprep.subr.mxu1 %v3212_v1 }
 0xd61   : > { %3840 = vmatpush3.msra.mxu1 %v3196_v2 }
 0xd62   : > { %3841 = vmatprep.subr.mxu1 %v3211_v3 }
 0xd63   : > { %3842 = vmatpush3.msra.mxu1 %v3195_v4 }
 0xd64   : > { %3843 = vmatprep.subr.mxu1 %v3210_v6 }
 0xd65   : > { %3844 = vmatpush3.msra.mxu1 %v3194_v7 }
 0xd66   : > { %3845 = vmatprep.subr.mxu1 %v3209_v10 }
 0xd67   : > { %3846 = vmatpush3.msra.mxu1 %v3193_v12 }
 0xd68   : > { %3847 = vmatprep.subr.mxu1 %v3208_v5 }
 0xd69   : > { %3848 = vmatpush3.msra.mxu1 %v3192_v13 }
 0xd6a   : > { %3849 = vmatprep.subr.mxu1 %v3207_v11 }
 0xd6b   : > { %3850 = vmatpush3.msra.mxu1 %v3191_v8 }
 0xd6c   : > { %3851 = vmatprep.subr.mxu1 %v3206_v14 }
 0xd6d   : > { %3852 = vmatpush3.msra.mxu1 %v3190_v9 }
 0xd6e   : > { %3853 = vmatprep.subr.mxu1 %v3205_v15 }
 0xd6f   : > { %3854 = vmatpush3.msra.mxu1 %v3189_v18 }
 0xd70   : > { %3855 = vmatprep.subr.mxu1 %v3204_v19 }
 0xd71   : > { %3856 = vmatpush3.msra.mxu1 %v3188_v20 }
 0xd72   : > { %3857 = vmatprep.subr.mxu1 %v3203_v21 }
 0xd73   : > { %3858 = vmatpush3.msra.mxu1 %v3187_v22 }
 0xd74   : > { %3859 = vmatprep.subr.mxu1 %v3202_v26 }
 0xd75   : > { %3860 = vmatpush3.msra.mxu1 %v3186_v27 }
 0xe0e   : > { %v3088_v30 = vpop.f32.mrf.mxu1 }
 0xe0f   : > { %v3174_v33 = vmul.f32 %v3088_v30, %v5730_v24 }
 0xe10   : > { %v3090_v31 = vpop.f32.mrf.mxu1 }
 0xe11   : > { %v3175_v17 = vmul.f32 %v3090_v31, %v5728_v23 }
 0xe12   : > { %v3094_v16 = vpop.f32.mrf.mxu1 }
 0xe13   : > { %v3177_v25 = vadd.f32 %v3174_v33, %v3094_v16 }
 0xe14   : > { %v3096_v34 = vpop.f32.mrf.mxu1 }
 0xe15   : > { %v3178_v36 = vadd.f32 %v3175_v17, %v3096_v34  ;;  %v3180_v37 = vmul.f32 0.01, %v3177_v25 }
 0xe16   : > { %v3937_v38 = vpop.f32.mrf.mxu1 }
 0xe17   : > { %v3181_v39 = vmul.f32 0.01, %v3178_v36  ;;  %v3183_v42 = vmax.f32 %v3177_v25, %v3180_v37 }
 0xe18   : > { %v3165_v40 = vpop.f32.mrf.mxu1 }
 0xe19   : > { %v3184_v35 = vmax.f32 %v3178_v36, %v3181_v39  ;;  %v3176_v41 = vmul.f32 %v3165_v40, %v5740_v32 }
 0xe1b   : > { %v3179_v43 = vadd.f32 %v3937_v38, %v3176_v41  ;;  %3294 = vmatprep.mubr.f32.mxu1 %v3184_v35 }
 0xe1c   : > { %3295 = vmatmul.mubr.f32.vlgmr.msra.gmra.mxu1 %v3183_v42 }
 0xe1d   : > { %v3182_v24 = vmul.f32 0.01, %v3179_v43 }
 0xe1f   : > { %v3185_v44 = vmax.f32 %v3179_v43, %v3182_v24 }
 0xe21   : > { %3943 = vmatmul.mubr.msk.f32.vlgmr.msra.gmra.mxu0 %vm2847_vm4, %v3185_v44 }
 0xedc   : > { %v3861_v23 = vpop.f32.mrf.mxu1 }
 0xede   : > { %v3862_v45 = vpop.f32.mrf.mxu1 }
 0xedf   : > { %v3863_v47 = vadd.f32 %v3862_v45, %v3861_v23 }
 0xee1   : > { %v3297_v48 = vadd.f32 %v3863_v47, %v3530_v46  ;;  %v3366_v49 = vpop.f32.mrf.mxu0 }
 0xee3   : > { %v3367_v32 = vadd.f32 %v3366_v49, %v3297_v48  ;;  %v3944_v50 = vpop.f32.mrf.mxu0 }
 0xee5   : > { %3969 = vtanh.f32 %v3367_v32 }
 0xef2   : > { %v3970_v51 = vpop.eup %3969 }
 0xef3   : > { %3371 = vst.msk [vmem:[%s729_s7] sm:$0xff] %vm744_vm0, %v3970_v51  ;;  %v3372_v53 = vsub.f32 %v3970_v51, %v3971_v52 }
 0xef5   : > { %v3373_v54 = vmul.f32 %v3372_v53, %v3372_v53 }
 0xef7   : > { %v3374_v55 = vsel %vm744_vm0, %v3373_v54, 0.0 }
 0xef8   : > { %3375 = vadd.xlane.f32.xlu0 %v3374_v55 }
 0xf81   : > { %v3376_v58 = vpop.xlane.xlu0 %3375 }
 0xf82   : > { %3396 = vst.msk [vmem:[%s4809_s1] sm:$0xff] %vm3395_vm7, %v3376_v58 }
 0xf83   : > { %3398 = vst.msk [vmem:[%s4809_s1] sm:$0xff] %vm3397_vm8, %v3393_v57 }
 0xf84 PF: > { %s34_s4 = sadd.s32 1, %s3978_s4  }
 0xf85   : > { %p31_p4 = scmp.ge.s32.totalorder %s34_s4, 4  }
 0xf87   :  { %33 = sbr.rel (!%p31_p4) target bundleno = 10 (0xa), region = 153 }

</bundles_post_ra>
